<compile_context>
chip_gen: v6e
topology: v6e:2x2x1
jax: 0.10.0
libtpu: 0.0.40
codegen_flags: <defaults>
</compile_context>

<pallas_src>
import functools

import jax
import jax.numpy as jnp
from jax import lax
from jax.experimental import pallas as pl
from jax.experimental.pallas import tpu as pltpu

NEG_SLOPE = 0.01  # nn.LeakyReLU default negative_slope
BN_EPS = 1e-5


def _leaky(x):
    return jnp.where(x > 0, x, NEG_SLOPE * x)


# --------------------- fused residual-block kernel ---------------------
def _fused_resblock_kernel(x_ref, xt_ref, xb_ref, w1_ref, b1_ref, w2_ref,
                           b2_ref, o_ref, *, fuse_k):
    # Per grid step (b, i):
    #   x_ref : (TH, W, C)   NHWC input tile (conv1 input + residual)
    #   xt_ref: (1, W, C)    image row just above the tile (clamped at top)
    #   xb_ref: (1, W, C)    image row just below the tile (clamped at bottom)
    #   w1_ref: (C, Cmid)    BN-scale-folded 1x1 weights
    #   b1_ref: (1, Cmid)    folded BN bias of conv1
    #   w2_ref: (9,Cmid,C) or (9*Cmid, C)   BN-scale-folded 3x3 weights
    #   b2_ref: (1, C)       folded BN bias of conv2
    #   o_ref : (TH, W, C)
    TH, W, C = x_ref.shape
    Cmid = w1_ref.shape[1]
    i = pl.program_id(1)
    n_tiles = pl.num_programs(1)

    # ---- conv1 (1x1) + BN + LeakyReLU on tile rows plus the 2 halo rows ----
    x_tile = x_ref[...]
    x_ext = jnp.concatenate([xt_ref[...], x_tile, xb_ref[...]], axis=0)  # (TH+2, W, C)
    h = jnp.dot(x_ext.reshape((TH + 2) * W, C).astype(w1_ref.dtype), w1_ref[...],
                preferred_element_type=jnp.float32)
    h = _leaky(h + b1_ref[...]).reshape(TH + 2, W, Cmid)

    # The 3x3 conv zero-pads h1 (not x): kill halo rows that fall outside the image.
    row = lax.broadcasted_iota(jnp.int32, (TH + 2, 1, 1), 0)
    outside = ((row == 0) & (i == 0)) | ((row == TH + 1) & (i == n_tiles - 1))
    h = jnp.where(outside, 0.0, h)

    # Zero-pad the W axis (the W image boundary lies inside every tile).
    hc = h.astype(w2_ref.dtype)
    zcol = jnp.zeros((TH + 2, 1, Cmid), hc.dtype)
    hp = jnp.concatenate([zcol, hc, zcol], axis=1)                       # (TH+2, W+2, Cmid)

    # ---- conv2 (3x3) from 9 shifted tap views + BN + LeakyReLU + residual ----
    taps = [hp[ky:ky + TH, kx:kx + W, :].reshape(TH * W, Cmid)
            for ky in range(3) for kx in range(3)]
    if fuse_k:
        # Lane-aligned channels: one K = 9*Cmid MXU dot.
        acc = jnp.dot(jnp.concatenate(taps, axis=-1), w2_ref[...],
                      preferred_element_type=jnp.float32)
    else:
        acc = jnp.zeros((TH * W, C), jnp.float32)
        for t in range(9):
            acc = acc + jnp.dot(taps[t], w2_ref[t],
                                preferred_element_type=jnp.float32)

    out = _leaky(acc + b2_ref[...]).reshape(TH, W, C) + x_tile.astype(jnp.float32)
    o_ref[...] = out.astype(o_ref.dtype)


# ------------------------------ wrapper ------------------------------
def fold_bn(gamma, beta, mean, var, eps=BN_EPS):
    scale = gamma / jnp.sqrt(var + eps)
    bias = beta - mean * scale
    return scale, bias


def _pick_row_tile(H, W, target_rows=1024):
    """Largest divisor of H whose tile has ~<= target_rows spatial rows."""
    best = 1
    for th in range(1, H + 1):
        if H % th == 0 and th * W <= max(target_rows, W):
            best = th
    return best


def residual_block_forward(x_nchw, p, *, row_tile=None,
                           compute_dtype=jnp.float32):
    N, C, H, W = x_nchw.shape
    Cmid = C // 2

    TH = _pick_row_tile(H, W) if row_tile is None else row_tile
    assert H % TH == 0, "row_tile must divide H"
    nT = H // TH

    x_nhwc = jnp.transpose(x_nchw, (0, 2, 3, 1)).astype(jnp.float32)     # (N, H, W, C)

    # One-row halos above/below each tile (clamped at image edges; the kernel
    # zeroes those h1 halo rows, matching the 3x3 conv's zero padding).
    rows = jnp.arange(nT) * TH
    x_top = x_nhwc[:, jnp.maximum(rows - 1, 0)]                          # (N, nT, W, C)
    x_bot = x_nhwc[:, jnp.minimum(rows + TH, H - 1)]                     # (N, nT, W, C)

    # Fold BN scale into conv weights (per output channel); keep folded bias.
    s1, b1 = fold_bn(p["g1"], p["b1"], p["m1"], p["v1"])
    s2, b2 = fold_bn(p["g2"], p["b2"], p["m2"], p["v2"])
    w1 = jnp.transpose(p["w1"][:, :, 0, 0], (1, 0)) * s1[None, :]        # (C, Cmid)
    w2 = jnp.stack([jnp.transpose(p["w2"][:, :, ky, kx], (1, 0)) * s2[None, :]
                    for ky in range(3) for kx in range(3)], axis=0)      # (9, Cmid, C)

    fuse_k = (Cmid % 128 == 0)          # single K=9*Cmid dot for lane-aligned widths
    if fuse_k:
        w2 = w2.reshape(9 * Cmid, C)
    w1 = w1.astype(compute_dtype)
    w2 = w2.astype(compute_dtype)

    kernel = functools.partial(_fused_resblock_kernel, fuse_k=fuse_k)
    w2_spec = (pl.BlockSpec((9 * Cmid, C), lambda b, i: (0, 0)) if fuse_k
               else pl.BlockSpec((9, Cmid, C), lambda b, i: (0, 0, 0)))

    out_nhwc = pl.pallas_call(
        kernel,
        grid=(N, nT),
        out_shape=jax.ShapeDtypeStruct((N, H, W, C), jnp.float32),
        in_specs=[
            pl.BlockSpec((None, TH, W, C), lambda b, i: (b, i, 0, 0)),   # x tile
            pl.BlockSpec((None, 1, W, C), lambda b, i: (b, i, 0, 0)),    # top halo row
            pl.BlockSpec((None, 1, W, C), lambda b, i: (b, i, 0, 0)),    # bottom halo row
            pl.BlockSpec((C, Cmid), lambda b, i: (0, 0)),                # w1 (resident)
            pl.BlockSpec((1, Cmid), lambda b, i: (0, 0)),                # b1 (resident)
            w2_spec,                                                     # w2 (resident)
            pl.BlockSpec((1, C), lambda b, i: (0, 0)),                   # b2 (resident)
        ],
        out_specs=pl.BlockSpec((None, TH, W, C), lambda b, i: (b, i, 0, 0)),
        compiler_params=pltpu.CompilerParams(
            dimension_semantics=("parallel", "parallel")),
    )(x_nhwc, x_top, x_bot, w1, b1.reshape(1, Cmid), w2, b2.reshape(1, C))

    return jnp.transpose(out_nhwc, (0, 3, 1, 2))                         # back to NCHW


# ---------------- deterministic parameter init ----------------
def init_params(key, C):
    Cmid = C // 2
    ks = jax.random.split(key, 10)
    return {
        # conv1: Conv2d(C, C//2, k=1, bias=False) -> weight (Cmid, C, 1, 1)
        "w1": jax.random.normal(ks[0], (Cmid, C, 1, 1), jnp.float32) / jnp.sqrt(C),
        "g1": 1.0 + 0.1 * jax.random.normal(ks[1], (Cmid,), jnp.float32),
        "b1": 0.1 * jax.random.normal(ks[2], (Cmid,), jnp.float32),
        "m1": 0.1 * jax.random.normal(ks[3], (Cmid,), jnp.float32),
        "v1": 1.0 + 0.1 * jax.random.uniform(ks[4], (Cmid,), jnp.float32),
        # conv2: Conv2d(C//2, C, k=3, pad=1, bias=False) -> weight (C, Cmid, 3, 3)
        "w2": jax.random.normal(ks[5], (C, Cmid, 3, 3), jnp.float32) / jnp.sqrt(9 * Cmid),
        "g2": 1.0 + 0.1 * jax.random.normal(ks[6], (C,), jnp.float32),
        "b2": 0.1 * jax.random.normal(ks[7], (C,), jnp.float32),
        "m2": 0.1 * jax.random.normal(ks[8], (C,), jnp.float32),
        "v2": 1.0 + 0.1 * jax.random.uniform(ks[9], (C,), jnp.float32),
    }


# -------- pure-JAX reference (NCHW, matches torch semantics, eval-mode BN) --------
def reference_forward(x, p):
    def bn(y, g, b, m, v):
        return ((y - m[None, :, None, None])
                / jnp.sqrt(v[None, :, None, None] + BN_EPS)
                * g[None, :, None, None] + b[None, :, None, None])

    dn = ("NCHW", "OIHW", "NCHW")
    h = lax.conv_general_dilated(x, p["w1"], (1, 1), "SAME", dimension_numbers=dn)
    h = _leaky(bn(h, p["g1"], p["b1"], p["m1"], p["v1"]))
    h2 = lax.conv_general_dilated(h, p["w2"], (1, 1), "SAME", dimension_numbers=dn)
    h2 = _leaky(bn(h2, p["g2"], p["b2"], p["m2"], p["v2"]))
    return h2 + x


if __name__ == "__main__":
    key = jax.random.PRNGKey(0)
    kx, kp = jax.random.split(key)
    N, C, H, W = 2, 4, 16, 16
    x = jax.random.normal(kx, (N, C, H, W), jnp.float32)
    params = init_params(kp, C)

    # row_tile=8 -> grid (N=2, nT=2): exercises pipelining and the halo logic.
    out = residual_block_forward(x, params, row_tile=8)
    out = jax.block_until_ready(out)

    ref = reference_forward(x, params)
    assert out.shape == x.shape
    err = float(jnp.max(jnp.abs(out - ref)))
    if not jnp.allclose(out, ref, atol=1e-4, rtol=1e-4):
        raise AssertionError(f"Pallas output mismatch vs reference, max abs err={err:e}")
    print("KERNEL_OK")
</pallas_src>

<mosaic_0001>
module attributes {stable_mosaic.version = 11 : i64} {
  func.func @_fused_resblock_kernel(%arg0: i32, %arg1: i32, %arg2: memref<1x8x16x4xf32, #tpu.memory_space<vmem>>, %arg3: memref<1x1x16x4xf32, #tpu.memory_space<vmem>>, %arg4: memref<1x1x16x4xf32, #tpu.memory_space<vmem>>, %arg5: memref<4x2xf32, #tpu.memory_space<vmem>>, %arg6: memref<1x2xf32, #tpu.memory_space<vmem>>, %arg7: memref<9x2x4xf32, #tpu.memory_space<vmem>>, %arg8: memref<1x4xf32, #tpu.memory_space<vmem>>, %arg9: memref<1x8x16x4xf32, #tpu.memory_space<vmem>>) attributes {dimension_semantics = [#tpu.dimension_semantics<parallel>, #tpu.dimension_semantics<parallel>], iteration_bounds = array<i64: 2, 2>, scalar_prefetch = 0 : i64, scratch_operands = 0 : i64, tpu.core_type = #tpu.core_type<tc>, window_params = [{transform_indices = @transform_0, window_bounds = array<i64: 1, 8, 16, 4>}, {transform_indices = @transform_1, window_bounds = array<i64: 1, 1, 16, 4>}, {transform_indices = @transform_2, window_bounds = array<i64: 1, 1, 16, 4>}, {pipeline_mode = #tpu.pipeline_mode<synchronous>, transform_indices = @transform_3, window_bounds = array<i64: 4, 2>}, {pipeline_mode = #tpu.pipeline_mode<synchronous>, transform_indices = @transform_4, window_bounds = array<i64: 1, 2>}, {pipeline_mode = #tpu.pipeline_mode<synchronous>, transform_indices = @transform_5, window_bounds = array<i64: 9, 2, 4>}, {pipeline_mode = #tpu.pipeline_mode<synchronous>, transform_indices = @transform_6, window_bounds = array<i64: 1, 4>}, {transform_indices = @transform_7, window_bounds = array<i64: 1, 8, 16, 4>}]} {
    %c0 = arith.constant 0 : index
    %c0_0 = arith.constant 0 : index
    %c0_1 = arith.constant 0 : index
    %c0_2 = arith.constant 0 : index
    %0 = vector.load %arg2[%c0, %c0_0, %c0_1, %c0_2] : memref<1x8x16x4xf32, #tpu.memory_space<vmem>>, vector<1x8x16x4xf32>
    %1 = vector.shape_cast %0 : vector<1x8x16x4xf32> to vector<8x16x4xf32>
    %c0_3 = arith.constant 0 : index
    %c0_4 = arith.constant 0 : index
    %c0_5 = arith.constant 0 : index
    %c0_6 = arith.constant 0 : index
    %2 = vector.load %arg3[%c0_3, %c0_4, %c0_5, %c0_6] : memref<1x1x16x4xf32, #tpu.memory_space<vmem>>, vector<1x1x16x4xf32>
    %3 = vector.shape_cast %2 : vector<1x1x16x4xf32> to vector<1x16x4xf32>
    %c0_7 = arith.constant 0 : index
    %c0_8 = arith.constant 0 : index
    %c0_9 = arith.constant 0 : index
    %c0_10 = arith.constant 0 : index
    %4 = vector.load %arg4[%c0_7, %c0_8, %c0_9, %c0_10] : memref<1x1x16x4xf32, #tpu.memory_space<vmem>>, vector<1x1x16x4xf32>
    %5 = vector.shape_cast %4 : vector<1x1x16x4xf32> to vector<1x16x4xf32>
    %6 = tpu.concatenate %3, %1, %5 in 0 : vector<1x16x4xf32>, vector<8x16x4xf32>, vector<1x16x4xf32> -> vector<10x16x4xf32>
    %7 = vector.shape_cast %6 : vector<10x16x4xf32> to vector<160x4xf32>
    %c0_11 = arith.constant 0 : index
    %c0_12 = arith.constant 0 : index
    %8 = vector.load %arg5[%c0_11, %c0_12] : memref<4x2xf32, #tpu.memory_space<vmem>>, vector<4x2xf32>
    %cst = arith.constant dense<0.000000e+00> : vector<160x2xf32>
    %9 = tpu.matmul %7, %8, %cst {dimension_numbers = #tpu.dot_dimension_numbers<[1], [0], [0], [1], [0, 0, 1, 1], [], []>} : vector<160x4xf32>, vector<4x2xf32>, vector<160x2xf32> -> vector<160x2xf32>
    %c0_13 = arith.constant 0 : index
    %c0_14 = arith.constant 0 : index
    %10 = vector.load %arg6[%c0_13, %c0_14] : memref<1x2xf32, #tpu.memory_space<vmem>>, vector<1x2xf32>
    %11 = vector.broadcast %10 : vector<1x2xf32> to vector<160x2xf32>
    %12 = arith.addf %9, %11 : vector<160x2xf32>
    %cst_15 = arith.constant 0.000000e+00 : f32
    %13 = vector.broadcast %cst_15 : f32 to vector<160x2xf32>
    %14 = arith.cmpf ogt, %12, %13 : vector<160x2xf32>
    %cst_16 = arith.constant 0.00999999977 : f32
    %15 = vector.broadcast %cst_16 : f32 to vector<160x2xf32>
    %16 = arith.mulf %15, %12 : vector<160x2xf32>
    %17 = arith.select %14, %12, %16 : vector<160x2xi1>, vector<160x2xf32>
    %18 = vector.shape_cast %17 : vector<160x2xf32> to vector<10x16x2xf32>
    %19 = tpu.iota {dimensions = array<i32: 0>} : vector<10x1x1xi32>
    %c0_i32 = arith.constant 0 : i32
    %20 = vector.broadcast %c0_i32 : i32 to vector<10x1x1xi32>
    %21 = arith.cmpi eq, %19, %20 : vector<10x1x1xi32>
    %c0_i32_17 = arith.constant 0 : i32
    %22 = arith.cmpi eq, %arg1, %c0_i32_17 : i32
    %23 = vector.broadcast %22 : i1 to vector<10x1x1xi1>
    %24 = arith.andi %21, %23 : vector<10x1x1xi1>
    %c9_i32 = arith.constant 9 : i32
    %25 = vector.broadcast %c9_i32 : i32 to vector<10x1x1xi32>
    %26 = arith.cmpi eq, %19, %25 : vector<10x1x1xi32>
    %c1_i32 = arith.constant 1 : i32
    %27 = arith.cmpi eq, %arg1, %c1_i32 : i32
    %28 = vector.broadcast %27 : i1 to vector<10x1x1xi1>
    %29 = arith.andi %26, %28 : vector<10x1x1xi1>
    %30 = arith.ori %24, %29 : vector<10x1x1xi1>
    %cst_18 = arith.constant 0.000000e+00 : f32
    %31 = vector.shape_cast %30 : vector<10x1x1xi1> to vector<10x1x1xi1>
    %32 = vector.broadcast %31 : vector<10x1x1xi1> to vector<10x16x2xi1>
    %33 = vector.broadcast %cst_18 : f32 to vector<10x16x2xf32>
    %34 = arith.select %32, %33, %18 : vector<10x16x2xi1>, vector<10x16x2xf32>
    %cst_19 = arith.constant 0.000000e+00 : f32
    %35 = vector.broadcast %cst_19 : f32 to vector<10x1x2xf32>
    %36 = tpu.concatenate %35, %34, %35 in 1 : vector<10x1x2xf32>, vector<10x16x2xf32>, vector<10x1x2xf32> -> vector<10x18x2xf32>
    %37 = vector.extract_strided_slice %36 {offsets = [0, 0, 0], sizes = [8, 16, 2], strides = [1, 1, 1]} : vector<10x18x2xf32> to vector<8x16x2xf32>
    %38 = vector.shape_cast %37 : vector<8x16x2xf32> to vector<128x2xf32>
    %39 = vector.extract_strided_slice %36 {offsets = [0, 1, 0], sizes = [8, 16, 2], strides = [1, 1, 1]} : vector<10x18x2xf32> to vector<8x16x2xf32>
    %40 = vector.shape_cast %39 : vector<8x16x2xf32> to vector<128x2xf32>
    %41 = vector.extract_strided_slice %36 {offsets = [0, 2, 0], sizes = [8, 16, 2], strides = [1, 1, 1]} : vector<10x18x2xf32> to vector<8x16x2xf32>
    %42 = vector.shape_cast %41 : vector<8x16x2xf32> to vector<128x2xf32>
    %43 = vector.extract_strided_slice %36 {offsets = [1, 0, 0], sizes = [8, 16, 2], strides = [1, 1, 1]} : vector<10x18x2xf32> to vector<8x16x2xf32>
    %44 = vector.shape_cast %43 : vector<8x16x2xf32> to vector<128x2xf32>
    %45 = vector.extract_strided_slice %36 {offsets = [1, 1, 0], sizes = [8, 16, 2], strides = [1, 1, 1]} : vector<10x18x2xf32> to vector<8x16x2xf32>
    %46 = vector.shape_cast %45 : vector<8x16x2xf32> to vector<128x2xf32>
    %47 = vector.extract_strided_slice %36 {offsets = [1, 2, 0], sizes = [8, 16, 2], strides = [1, 1, 1]} : vector<10x18x2xf32> to vector<8x16x2xf32>
    %48 = vector.shape_cast %47 : vector<8x16x2xf32> to vector<128x2xf32>
    %49 = vector.extract_strided_slice %36 {offsets = [2, 0, 0], sizes = [8, 16, 2], strides = [1, 1, 1]} : vector<10x18x2xf32> to vector<8x16x2xf32>
    %50 = vector.shape_cast %49 : vector<8x16x2xf32> to vector<128x2xf32>
    %51 = vector.extract_strided_slice %36 {offsets = [2, 1, 0], sizes = [8, 16, 2], strides = [1, 1, 1]} : vector<10x18x2xf32> to vector<8x16x2xf32>
    %52 = vector.shape_cast %51 : vector<8x16x2xf32> to vector<128x2xf32>
    %53 = vector.extract_strided_slice %36 {offsets = [2, 2, 0], sizes = [8, 16, 2], strides = [1, 1, 1]} : vector<10x18x2xf32> to vector<8x16x2xf32>
    %54 = vector.shape_cast %53 : vector<8x16x2xf32> to vector<128x2xf32>
    %cst_20 = arith.constant 0.000000e+00 : f32
    %55 = vector.broadcast %cst_20 : f32 to vector<128x4xf32>
    %c0_21 = arith.constant 0 : index
    %c0_22 = arith.constant 0 : index
    %c0_23 = arith.constant 0 : index
    %56 = vector.load %arg7[%c0_21, %c0_22, %c0_23] : memref<9x2x4xf32, #tpu.memory_space<vmem>>, vector<1x2x4xf32>
    %57 = vector.shape_cast %56 : vector<1x2x4xf32> to vector<2x4xf32>
    %cst_24 = arith.constant dense<0.000000e+00> : vector<128x4xf32>
    %58 = tpu.matmul %38, %57, %cst_24 {dimension_numbers = #tpu.dot_dimension_numbers<[1], [0], [0], [1], [0, 0, 1, 1], [], []>} : vector<128x2xf32>, vector<2x4xf32>, vector<128x4xf32> -> vector<128x4xf32>
    %59 = arith.addf %55, %58 : vector<128x4xf32>
    %c1 = arith.constant 1 : index
    %c0_25 = arith.constant 0 : index
    %c0_26 = arith.constant 0 : index
    %60 = vector.load %arg7[%c1, %c0_25, %c0_26] : memref<9x2x4xf32, #tpu.memory_space<vmem>>, vector<1x2x4xf32>
    %61 = vector.shape_cast %60 : vector<1x2x4xf32> to vector<2x4xf32>
    %cst_27 = arith.constant dense<0.000000e+00> : vector<128x4xf32>
    %62 = tpu.matmul %40, %61, %cst_27 {dimension_numbers = #tpu.dot_dimension_numbers<[1], [0], [0], [1], [0, 0, 1, 1], [], []>} : vector<128x2xf32>, vector<2x4xf32>, vector<128x4xf32> -> vector<128x4xf32>
    %63 = arith.addf %59, %62 : vector<128x4xf32>
    %c2 = arith.constant 2 : index
    %c0_28 = arith.constant 0 : index
    %c0_29 = arith.constant 0 : index
    %64 = vector.load %arg7[%c2, %c0_28, %c0_29] : memref<9x2x4xf32, #tpu.memory_space<vmem>>, vector<1x2x4xf32>
    %65 = vector.shape_cast %64 : vector<1x2x4xf32> to vector<2x4xf32>
    %cst_30 = arith.constant dense<0.000000e+00> : vector<128x4xf32>
    %66 = tpu.matmul %42, %65, %cst_30 {dimension_numbers = #tpu.dot_dimension_numbers<[1], [0], [0], [1], [0, 0, 1, 1], [], []>} : vector<128x2xf32>, vector<2x4xf32>, vector<128x4xf32> -> vector<128x4xf32>
    %67 = arith.addf %63, %66 : vector<128x4xf32>
    %c3 = arith.constant 3 : index
    %c0_31 = arith.constant 0 : index
    %c0_32 = arith.constant 0 : index
    %68 = vector.load %arg7[%c3, %c0_31, %c0_32] : memref<9x2x4xf32, #tpu.memory_space<vmem>>, vector<1x2x4xf32>
    %69 = vector.shape_cast %68 : vector<1x2x4xf32> to vector<2x4xf32>
    %cst_33 = arith.constant dense<0.000000e+00> : vector<128x4xf32>
    %70 = tpu.matmul %44, %69, %cst_33 {dimension_numbers = #tpu.dot_dimension_numbers<[1], [0], [0], [1], [0, 0, 1, 1], [], []>} : vector<128x2xf32>, vector<2x4xf32>, vector<128x4xf32> -> vector<128x4xf32>
    %71 = arith.addf %67, %70 : vector<128x4xf32>
    %c4 = arith.constant 4 : index
    %c0_34 = arith.constant 0 : index
    %c0_35 = arith.constant 0 : index
    %72 = vector.load %arg7[%c4, %c0_34, %c0_35] : memref<9x2x4xf32, #tpu.memory_space<vmem>>, vector<1x2x4xf32>
    %73 = vector.shape_cast %72 : vector<1x2x4xf32> to vector<2x4xf32>
    %cst_36 = arith.constant dense<0.000000e+00> : vector<128x4xf32>
    %74 = tpu.matmul %46, %73, %cst_36 {dimension_numbers = #tpu.dot_dimension_numbers<[1], [0], [0], [1], [0, 0, 1, 1], [], []>} : vector<128x2xf32>, vector<2x4xf32>, vector<128x4xf32> -> vector<128x4xf32>
    %75 = arith.addf %71, %74 : vector<128x4xf32>
    %c5 = arith.constant 5 : index
    %c0_37 = arith.constant 0 : index
    %c0_38 = arith.constant 0 : index
    %76 = vector.load %arg7[%c5, %c0_37, %c0_38] : memref<9x2x4xf32, #tpu.memory_space<vmem>>, vector<1x2x4xf32>
    %77 = vector.shape_cast %76 : vector<1x2x4xf32> to vector<2x4xf32>
    %cst_39 = arith.constant dense<0.000000e+00> : vector<128x4xf32>
    %78 = tpu.matmul %48, %77, %cst_39 {dimension_numbers = #tpu.dot_dimension_numbers<[1], [0], [0], [1], [0, 0, 1, 1], [], []>} : vector<128x2xf32>, vector<2x4xf32>, vector<128x4xf32> -> vector<128x4xf32>
    %79 = arith.addf %75, %78 : vector<128x4xf32>
    %c6 = arith.constant 6 : index
    %c0_40 = arith.constant 0 : index
    %c0_41 = arith.constant 0 : index
    %80 = vector.load %arg7[%c6, %c0_40, %c0_41] : memref<9x2x4xf32, #tpu.memory_space<vmem>>, vector<1x2x4xf32>
    %81 = vector.shape_cast %80 : vector<1x2x4xf32> to vector<2x4xf32>
    %cst_42 = arith.constant dense<0.000000e+00> : vector<128x4xf32>
    %82 = tpu.matmul %50, %81, %cst_42 {dimension_numbers = #tpu.dot_dimension_numbers<[1], [0], [0], [1], [0, 0, 1, 1], [], []>} : vector<128x2xf32>, vector<2x4xf32>, vector<128x4xf32> -> vector<128x4xf32>
    %83 = arith.addf %79, %82 : vector<128x4xf32>
    %c7 = arith.constant 7 : index
    %c0_43 = arith.constant 0 : index
    %c0_44 = arith.constant 0 : index
    %84 = vector.load %arg7[%c7, %c0_43, %c0_44] : memref<9x2x4xf32, #tpu.memory_space<vmem>>, vector<1x2x4xf32>
    %85 = vector.shape_cast %84 : vector<1x2x4xf32> to vector<2x4xf32>
    %cst_45 = arith.constant dense<0.000000e+00> : vector<128x4xf32>
    %86 = tpu.matmul %52, %85, %cst_45 {dimension_numbers = #tpu.dot_dimension_numbers<[1], [0], [0], [1], [0, 0, 1, 1], [], []>} : vector<128x2xf32>, vector<2x4xf32>, vector<128x4xf32> -> vector<128x4xf32>
    %87 = arith.addf %83, %86 : vector<128x4xf32>
    %c8 = arith.constant 8 : index
    %c0_46 = arith.constant 0 : index
    %c0_47 = arith.constant 0 : index
    %88 = vector.load %arg7[%c8, %c0_46, %c0_47] : memref<9x2x4xf32, #tpu.memory_space<vmem>>, vector<1x2x4xf32>
    %89 = vector.shape_cast %88 : vector<1x2x4xf32> to vector<2x4xf32>
    %cst_48 = arith.constant dense<0.000000e+00> : vector<128x4xf32>
    %90 = tpu.matmul %54, %89, %cst_48 {dimension_numbers = #tpu.dot_dimension_numbers<[1], [0], [0], [1], [0, 0, 1, 1], [], []>} : vector<128x2xf32>, vector<2x4xf32>, vector<128x4xf32> -> vector<128x4xf32>
    %91 = arith.addf %87, %90 : vector<128x4xf32>
    %c0_49 = arith.constant 0 : index
    %c0_50 = arith.constant 0 : index
    %92 = vector.load %arg8[%c0_49, %c0_50] : memref<1x4xf32, #tpu.memory_space<vmem>>, vector<1x4xf32>
    %93 = vector.broadcast %92 : vector<1x4xf32> to vector<128x4xf32>
    %94 = arith.addf %91, %93 : vector<128x4xf32>
    %cst_51 = arith.constant 0.000000e+00 : f32
    %95 = vector.broadcast %cst_51 : f32 to vector<128x4xf32>
    %96 = arith.cmpf ogt, %94, %95 : vector<128x4xf32>
    %cst_52 = arith.constant 0.00999999977 : f32
    %97 = vector.broadcast %cst_52 : f32 to vector<128x4xf32>
    %98 = arith.mulf %97, %94 : vector<128x4xf32>
    %99 = arith.select %96, %94, %98 : vector<128x4xi1>, vector<128x4xf32>
    %100 = vector.shape_cast %99 : vector<128x4xf32> to vector<8x16x4xf32>
    %101 = arith.addf %100, %1 : vector<8x16x4xf32>
    %c0_53 = arith.constant 0 : index
    %c0_54 = arith.constant 0 : index
    %c0_55 = arith.constant 0 : index
    %c0_56 = arith.constant 0 : index
    %102 = vector.load %arg9[%c0_53, %c0_54, %c0_55, %c0_56] : memref<1x8x16x4xf32, #tpu.memory_space<vmem>>, vector<1x8x16x4xf32>
    %103 = vector.shape_cast %102 : vector<1x8x16x4xf32> to vector<8x16x4xf32>
    %104 = vector.shape_cast %101 : vector<8x16x4xf32> to vector<1x8x16x4xf32>
    tpu.vector_store %arg9[%c0_53, %c0_54, %c0_55, %c0_56], %104 {strides = array<i32>} : memref<1x8x16x4xf32, #tpu.memory_space<vmem>>, vector<1x8x16x4xf32>,
    return
  }
  func.func @transform_0(%arg0: i32, %arg1: i32) -> (i32, i32, i32, i32) {
    %c0_i32 = arith.constant 0 : i32
    %c0_i32_0 = arith.constant 0 : i32
    %c0_i32_1 = arith.constant 0 : i32
    return %arg0, %arg1, %c0_i32, %c0_i32_0 : i32, i32, i32, i32
  }
  func.func @transform_1(%arg0: i32, %arg1: i32) -> (i32, i32, i32, i32) {
    %c0_i32 = arith.constant 0 : i32
    %c0_i32_0 = arith.constant 0 : i32
    %c0_i32_1 = arith.constant 0 : i32
    return %arg0, %arg1, %c0_i32, %c0_i32_0 : i32, i32, i32, i32
  }
  func.func @transform_2(%arg0: i32, %arg1: i32) -> (i32, i32, i32, i32) {
    %c0_i32 = arith.constant 0 : i32
    %c0_i32_0 = arith.constant 0 : i32
    %c0_i32_1 = arith.constant 0 : i32
    return %arg0, %arg1, %c0_i32, %c0_i32_0 : i32, i32, i32, i32
  }
  func.func @transform_3(%arg0: i32, %arg1: i32) -> (i32, i32) {
    %c0_i32 = arith.constant 0 : i32
    %c0_i32_0 = arith.constant 0 : i32
    %c0_i32_1 = arith.constant 0 : i32
    return %c0_i32, %c0_i32_0 : i32, i32
  }
  func.func @transform_4(%arg0: i32, %arg1: i32) -> (i32, i32) {
    %c0_i32 = arith.constant 0 : i32
    %c0_i32_0 = arith.constant 0 : i32
    %c0_i32_1 = arith.constant 0 : i32
    return %c0_i32, %c0_i32_0 : i32, i32
  }
  func.func @transform_5(%arg0: i32, %arg1: i32) -> (i32, i32, i32) {
    %c0_i32 = arith.constant 0 : i32
    %c0_i32_0 = arith.constant 0 : i32
    %c0_i32_1 = arith.constant 0 : i32
    %c0_i32_2 = arith.constant 0 : i32
    return %c0_i32, %c0_i32_0, %c0_i32_1 : i32, i32, i32
  }
  func.func @transform_6(%arg0: i32, %arg1: i32) -> (i32, i32) {
    %c0_i32 = arith.constant 0 : i32
    %c0_i32_0 = arith.constant 0 : i32
    %c0_i32_1 = arith.constant 0 : i32
    return %c0_i32, %c0_i32_0 : i32, i32
  }
  func.func @transform_7(%arg0: i32, %arg1: i32) -> (i32, i32, i32, i32) {
    %c0_i32 = arith.constant 0 : i32
    %c0_i32_0 = arith.constant 0 : i32
    %c0_i32_1 = arith.constant 0 : i32
    return %arg0, %arg1, %c0_i32, %c0_i32_0 : i32, i32, i32, i32
  }
}

</mosaic_0001>

<bundles_post_ra>
// kernel: tpu_custom_call.1
= control target key start
LH: loop header
LB: loop body
LE: loop exit
PB: predicated region body
PF: predicated region fallthrough
CT: control target
= control target key end

     0   :  { %s3564_s24 = smov 0   ;;  %s3566_s25 = smov 0   ;;  %s4607_s0 = inlined_call_operand.vmem [shape: f32[2,16,16,4], index: 0, kind: input, shape index: {}]   ;;  %s4608_s1 = inlined_call_operand.vmem [shape: f32[2,2,16,4], index: 1, kind: input, shape index: {}]   ;;  %s4609_s2 = inlined_call_operand.vmem [shape: f32[2,2,16,4], index: 2, kind: input, shape index: {}]   ;;  %s4610_s3 = inlined_call_operand.vmem [shape: f32[4,2], index: 3, kind: input, shape index: {}]   ;;  %s4611_s4 = inlined_call_operand.vmem [shape: f32[1,2], index: 4, kind: input, shape index: {}]   ;;  %s4612_s5 = inlined_call_operand.vmem [shape: f32[9,2,4], index: 5, kind: input, shape index: {}]   ;;  %s4613_s6 = inlined_call_operand.vmem [shape: f32[1,4], index: 6, kind: input, shape index: {}]   ;;  %s4614_s7 = inlined_call_operand.vmem [shape: f32[2,16,16,4], index: 7, kind: output, shape index: {}]  }
   0x1   :  { %s3568_s26 = smov 0   ;;  %s3570_s27 = smov 0  }
   0x2   :  { %s3572_s28 = smov 0  }
   0x3 LB: > { %s26_s29 = sadd.s32 1, %s3514_s26  ;;  %s29_s30 = sadd.s32 1, %s3518_s27  ;;  %s3522_s28 = sphi %s3572_s28, %s17_s28   ;;  %s3518_s27 = sphi %s3570_s27, %s4680_s27   ;;  %s3514_s26 = sphi %s3568_s26, %s4679_s26   ;;  %s3510_s25 = sphi %s3566_s25, %s4678_s25   ;;  %s3506_s24 = sphi %s3564_s24, %s4677_s24  }
   0x4   : > { %p27_p0 = scmp.ge.s32.totalorder %s26_s29, 2  ;;  %p2785_p1 = scmp.ge.s32.totalorder %s3522_s28, 1 }
   0x5   : > { %p291_p2 = scmp.lt.s32.totalorder %s3522_s28, 5 }
   0x6   : > { %s4682_s29 = smov (%p27_p0, %s26_s29), 0  ;;  %s4684_s30 = smov (!%p27_p0, %s29_s30), %s3518_s27 }
   0x7   : > { %p292_p3 = pnand %p2785_p1, %p291_p2  ;;  %p31_p4 = scmp.ge.s32.totalorder %s4684_s30, 2 }
   0x9   : > { %s4686_s30 = smov (%p31_p4, %s4684_s30), 0  ;;  %295 = sbr.rel (%p292_p3) target bundleno = 613 (0x265), region = 48 }
   0xe   : > { %v411_v0 = vld [vmem:[%s4610_s3] sm:$0xf]  ;;  %vm480_vm0 = vcmask 1043456   ;;  %s2786_s10 = sshll.u32 %s3506_s24, 3  ;;  %p352_p5 = scmp.lt.s32.totalorder %s3510_s25, 1  ;;  %vm419_vm1 = vcmask 31744  }
   0xf   : > { %3160 = vmatprep.subr.msk.mxu0 %vm480_vm0, %v411_v0  ;;  %p354_p6 = scmp.lt.s32.totalorder %s2786_s10, 15  ;;  %3426 = vmatprep.subr.msk.mxu1 %vm480_vm0, %v411_v0  ;;  %p364_p7 = scmp.lt.s32.totalorder %s3506_s24, 1  ;;  %v2822_v21 = vld [vmem:[%s4612_s5 + $0x2] sm:$0x3]  ;;  %vm990_vm2 = vcmask 1041408   ;;  %vm761_vm4 = vcmask 1040384  }
  0x10   : > { %3161 = vmatpush3.msk.msra.mxu0 %vm480_vm0, %v411_v0  ;;  %s4688_s25 = smov (!%p352_p5, %s3510_s25), 1  ;;  %3427 = vmatpush3.msk.msra.mxu1 %vm480_vm0, %v411_v0  ;;  %v2857_v22 = vld [vmem:[%s4612_s5 + $0x4] sm:$0x3]  ;;  %v3667_v23 = vld [vmem:[%s4612_s5] sm:$0x3]  ;;  %p709_p8 = scmp.eq.s32.totalorder %s3506_s24, 0 }
  0x11   : > { %s4690_s10 = smov (!%p354_p6, %s2786_s10), 15  ;;  %s2788_s11 = sshll.u32 %s4688_s25, 5  ;;  %3192 = vmatprep.subr.msk.mxu1 %vm990_vm2, %v2822_v21  ;;  %3244 = vmatprep.subr.msk.mxu0 %vm990_vm2, %v2857_v22  ;;  %v3674_v24 = vld [vmem:[%s4612_s5 + $0x8] sm:$0x3]  ;;  %v3683_v25 = vld [vmem:[%s4611_s4] ss:$0 sm:$0xff] }
  0x12   : > { %s2787_s12 = sshll.u32 %s4690_s10, 1  ;;  %s2791_s15 = sshll.u32 %s4688_s25, 2  ;;  %vm848_vm7 = vcmask 1046528   ;;  %vm957_vm12 = vcmask 15360   ;;  %vm889_vm13 = vcmask 1045504  }
  0x13   : > { %s3601_s13 = sadd.s32 %s2788_s11, %s2787_s12  ;;  %p713_p9 = scmp.eq.s32.totalorder %s3506_s24, 1 }
  0x14   : > { %s2789_s14 = sshll.u32 %s3601_s13, 3 }
  0x15   : > { %s365_s16 = scalar_select %p364_p7, %s3506_s24, 1 }
  0x16   : > { %s3610_s19 = scalar_lea.vmem %s4607_s0, %s2789_s14  ;;  %s4502_s25 = scalar_lea.vmem %s4614_s7, %s2789_s14 }
  0x17   : > { %s2790_s20 = sshll.u32 %s365_s16, 1  ;;  %v391_v1 = vld [vmem:[%s3610_s19] sm:$0xff]  ;;  %v392_v6 = vld [vmem:[%s3610_s19 + $0x8] sm:$0xff]  ;;  %v393_v7 = vld [vmem:[%s3610_s19 + $0x10] sm:$0xff] }
  0x18   : > { %s368_s21 = sadd.s32 %s2791_s15, %s2790_s20  ;;  %v394_v8 = vld [vmem:[%s3610_s19 + $0x18] sm:$0xff]  ;;  %v395_v9 = vld [vmem:[%s3610_s19 + $0x20] sm:$0xff]  ;;  %v396_v10 = vld [vmem:[%s3610_s19 + $0x28] sm:$0xff] }
  0x19   : > { %s2792_s22 = sshll.u32 %s368_s21, 3  ;;  %v397_v11 = vld [vmem:[%s3610_s19 + $0x30] sm:$0xff]  ;;  %v398_v12 = vld [vmem:[%s3610_s19 + $0x38] sm:$0xff]  ;;  %v399_v13 = vld [vmem:[%s3610_s19 + $0x40] sm:$0xff] }
  0x1a   : > { %s370_s9 = scalar_lea.vmem %s4608_s1, %s2792_s22  ;;  %s379_s11 = scalar_lea.vmem %s4609_s2, %s2792_s22  ;;  %v400_v14 = vld [vmem:[%s3610_s19 + $0x48] sm:$0xff]  ;;  %v401_v15 = vld [vmem:[%s3610_s19 + $0x50] sm:$0xff]  ;;  %v402_v16 = vld [vmem:[%s3610_s19 + $0x58] sm:$0xff] }
  0x1b   : > { %v407_v2 = vld [vmem:[%s370_s9] sm:$0xff]  ;;  %v408_v3 = vld [vmem:[%s370_s9 + $0x8] sm:$0xff]  ;;  %v405_v19 = vld [vmem:[%s3610_s19 + $0x70] sm:$0xff]  ;;  %s710_s23 = scalar_select %p709_p8, 1, 0 }
  0x1c   : > { %v409_v4 = vld [vmem:[%s379_s11] sm:$0xff]  ;;  %3162 = vmatprep.mubr.msk.f32.mxu0 %vm419_vm1, %v407_v2  ;;  %v410_v5 = vld [vmem:[%s379_s11 + $0x8] sm:$0xff]  ;;  %v406_v20 = vld [vmem:[%s3610_s19 + $0x78] sm:$0xff]  ;;  %s714_s8 = scalar_select %p713_p9, 1, 0 }
  0x1d   : > { %3189 = vmatprep.mubr.msk.f32.mxu1 %vm419_vm1, %v409_v4  ;;  %3163 = vmatmul.mubr.msk.f32.vlgmr.msra.gmra.mxu0 %vm419_vm1, %v408_v3  ;;  %v403_v17 = vld [vmem:[%s3610_s19 + $0x60] sm:$0xff]  ;;  %v404_v18 = vld [vmem:[%s3610_s19 + $0x68] sm:$0xff]  ;;  %v711_v26 = vstv %s710_s23 }
  0x1e   : > { %3190 = vmatmul.mubr.msk.f32.vlgmr.msra.gmra.mxu1 %vm419_vm1, %v410_v5  ;;  %3165 = vmatprep.mubr.msk.f32.mxu0 %vm419_vm1, %v391_v1  ;;  %v715_v31 = vstv %s714_s8  ;;  %vm3687_vm3 = vcmp.eq.s32.totalorder %v711_v26, 1 }
  0x1f   : > { %3193 = vmatpush3.msk.msra.mxu1 %vm990_vm2, %v2822_v21  ;;  %3245 = vmatpush3.msk.msra.mxu0 %vm990_vm2, %v2857_v22  ;;  %vm3692_vm8 = vcmp.eq.s32.totalorder %v715_v31, 1 }
  0x20   : > { %3218 = vmatprep.subr.msk.mxu1 %vm990_vm2, %v3667_v23  ;;  %3296 = vmatprep.subr.msk.mxu0 %vm990_vm2, %v3674_v24 }
  0x21   : > { %3166 = vmatmul.mubr.msk.f32.gmra.mxu0 %vm419_vm1, %v392_v6 }
  0x22   : > { %3168 = vmatprep.mubr.msk.f32.mxu0 %vm419_vm1, %v393_v7 }
  0x25   : > { %3169 = vmatmul.mubr.msk.f32.gmra.mxu0 %vm419_vm1, %v394_v8 }
  0x26   : > { %3171 = vmatprep.mubr.msk.f32.mxu0 %vm419_vm1, %v395_v9 }
  0x29   : > { %3172 = vmatmul.mubr.msk.f32.gmra.mxu0 %vm419_vm1, %v396_v10 }
  0x2a   : > { %3174 = vmatprep.mubr.msk.f32.mxu0 %vm419_vm1, %v397_v11 }
  0x2d   : > { %3175 = vmatmul.mubr.msk.f32.gmra.mxu0 %vm419_vm1, %v398_v12 }
  0x2e   : > { %3177 = vmatprep.mubr.msk.f32.mxu0 %vm419_vm1, %v399_v13 }
  0x31   : > { %3178 = vmatmul.mubr.msk.f32.gmra.mxu0 %vm419_vm1, %v400_v14 }
  0x32   : > { %3180 = vmatprep.mubr.msk.f32.mxu0 %vm419_vm1, %v401_v15 }
  0x35   : > { %3181 = vmatmul.mubr.msk.f32.gmra.mxu0 %vm419_vm1, %v402_v16 }
  0x36   : > { %3183 = vmatprep.mubr.msk.f32.mxu0 %vm419_vm1, %v403_v17 }
  0x39   : > { %3184 = vmatmul.mubr.msk.f32.gmra.mxu0 %vm419_vm1, %v404_v18 }
  0x3a   : > { %3186 = vmatprep.mubr.msk.f32.mxu0 %vm419_vm1, %v405_v19 }
  0x3d   : > { %3187 = vmatmul.mubr.msk.f32.gmra.mxu0 %vm419_vm1, %v406_v20 }
  0xdd   : > { %v3164_v27 = vpop.f32.mrf.mxu0 }
  0xde   : > { %v3191_v28 = vpop.f32.mrf.mxu1  ;;  %v556_v29 = vadd.f32 %v3164_v27, %v3683_v25 }
  0xdf   : > { %v646_v30 = vadd.f32 %v3191_v28, %v3683_v25  ;;  %v550_v33 = vpop.f32.mrf.mxu0 }
  0xe0   : > { %v640_v34 = vpop.f32.mrf.mxu1  ;;  %vm650_vm5 = vcmp.gt.f32.partialorder %v556_v29, 0.0  ;;  %v670_v35 = vmul.f32 0.01, %v556_v29  ;;  %v551_v36 = vadd.f32 %v3683_v25, %v550_v33 }
  0xe1   : > { %vm668_vm6 = vcmp.gt.f32.partialorder %v646_v30, 0.0  ;;  %v3167_v37 = vpop.f32.mrf.mxu0  ;;  %v688_v38 = vmul.f32 0.01, %v646_v30  ;;  %v641_v40 = vadd.f32 %v3683_v25, %v640_v34 }
  0xe2   : > { %v690_v41 = vsel %vm650_vm5, %v556_v29, %v670_v35  ;;  %vm649_vm9 = vcmp.gt.f32.partialorder %v551_v36, 0.0  ;;  %v669_v42 = vmul.f32 0.01, %v551_v36  ;;  %v566_v43 = vadd.f32 %v3167_v37, %v3683_v25 }
  0xe3   : > { %v722_v44 = vsel %vm3687_vm3, 0.0, %v690_v41  ;;  %v560_v45 = vpop.f32.mrf.mxu0  ;;  %v3700_v46 = vsel %vm668_vm6, %v646_v30, %v688_v38  ;;  %vm667_vm10 = vcmp.gt.f32.partialorder %v641_v40, 0.0  ;;  %v687_v47 = vmul.f32 0.01, %v641_v40  ;;  %v3752_v38 = vld [vmem:[%s4612_s5 + $0x6] sm:$0x3] }
  0xe4   : > { %v763_v48 = vrot.slane %v722_v44, 7  ;;  %v689_v49 = vsel %vm649_vm9, %v551_v36, %v669_v42  ;;  %vm652_vm11 = vcmp.gt.f32.partialorder %v566_v43, 0.0  ;;  %v672_v50 = vmul.f32 0.01, %v566_v43 }
  0xe5   : > { %v721_v51 = vsel %vm3687_vm3, 0.0, %v689_v49  ;;  %v561_v52 = vadd.f32 %v3683_v25, %v560_v45  ;;  %v3170_v53 = vpop.f32.mrf.mxu0  ;;  %v740_v54 = vsel %vm3692_vm8, 0.0, %v3700_v46  ;;  %v3715_v62 = vsel %vm667_vm10, %v641_v40, %v687_v47  ;;  %v3768_v49 = vld [vmem:[%s4612_s5 + $0xc] sm:$0x3] }
  0xe6   : > { %v3709_v55 = vsel %vm761_vm4, %v763_v48, 0.0  ;;  %v762_v56 = vrot.slane %v721_v51, 7  ;;  %v692_v57 = vsel %vm652_vm11, %v566_v43, %v672_v50  ;;  %v576_v58 = vadd.f32 %v3170_v53, %v3683_v25 }
  0xe7   : > { %v852_v59 = vrot.slane %v3709_v55, 1  ;;  %v893_v60 = vrot.slane %v3709_v55, 2  ;;  %vm651_vm14 = vcmp.gt.f32.partialorder %v561_v52, 0.0  ;;  %v570_v61 = vpop.f32.mrf.mxu0  ;;  %v671_v0 = vmul.f32 0.01, %v561_v52 }
  0xe8   : > { %v3718_v63 = vsel %vm761_vm4, 0.0, %v762_v56  ;;  %vm654_vm15 = vcmp.gt.f32.partialorder %v576_v58, 0.0  ;;  %v674_v1 = vmul.f32 0.01, %v576_v58  ;;  %v766_v2 = vrot.slane %v692_v57, 7 }
  0xe9   : > { %v571_v3 = vadd.f32 %v3683_v25, %v570_v61  ;;  %v3173_v4 = vpop.f32.mrf.mxu0  ;;  %v3722_v5 = vsel %vm761_vm4, %v762_v56, %v763_v48  ;;  %v849_v6 = vrot.slane %v3718_v63, 1  ;;  %v691_v7 = vsel %vm651_vm14, %v561_v52, %v671_v0 }
  0xea   : > { %v694_v8 = vsel %vm654_vm15, %v576_v58, %v674_v1  ;;  %v586_v9 = vadd.f32 %v3173_v4, %v3683_v25  ;;  %v850_v10 = vrot.slane %v3722_v5, 1  ;;  %v765_v11 = vrot.slane %v691_v7, 7 }
  0xeb   : > { %v769_v12 = vrot.slane %v694_v8, 7  ;;  %vm653_vm0 = vcmp.gt.f32.partialorder %v571_v3, 0.0  ;;  %v673_v13 = vmul.f32 0.01, %v571_v3  ;;  %v580_v14 = vpop.f32.mrf.mxu0  ;;  %v3730_v18 = vsel %vm761_vm4, %v766_v2, 0.0 }
  0xec   : > { %vm656_vm3 = vcmp.gt.f32.partialorder %v586_v9, 0.0  ;;  %v676_v15 = vmul.f32 0.01, %v586_v9  ;;  %v581_v16 = vadd.f32 %v3683_v25, %v580_v14  ;;  %v851_v17 = vsel %vm848_vm7, %v849_v6, %v850_v10 }
  0xed   : > { %v3733_v19 = vsel %vm761_vm4, %v765_v11, %v766_v2  ;;  %v3736_v20 = vsel %vm761_vm4, 0.0, %v765_v11  ;;  %v693_v21 = vsel %vm653_vm0, %v571_v3, %v673_v13  ;;  %3194 = vmatprep.mubr.msk.f32.mxu1 %vm957_vm12, %v851_v17  ;;  %v3176_v22 = vpop.f32.mrf.mxu0  ;;  %v890_v30 = vrot.slane %v3718_v63, 2 }
  0xee   : > { %v768_v26 = vrot.slane %v693_v21, 7  ;;  %v696_v27 = vsel %vm656_vm3, %v586_v9, %v676_v15  ;;  %vm655_vm5 = vcmp.gt.f32.partialorder %v581_v16, 0.0  ;;  %v675_v28 = vmul.f32 0.01, %v581_v16 }
  0xef   : > { %v772_v29 = vrot.slane %v696_v27, 7  ;;  %v891_v31 = vrot.slane %v3722_v5, 2  ;;  %v596_v32 = vadd.f32 %v3176_v22, %v3683_v25  ;;  %v590_v33 = vpop.f32.mrf.mxu0  ;;  %v3743_v34 = vsel %vm761_vm4, %v769_v12, 0.0 }
  0xf0   : > { %v3746_v35 = vsel %vm761_vm4, %v768_v26, %v769_v12  ;;  %v695_v36 = vsel %vm655_vm5, %v581_v16, %v675_v28  ;;  %v853_v37 = vsel %vm848_vm7, %v850_v10, %v852_v59  ;;  %v3755_v40 = vsel %vm761_vm4, 0.0, %v768_v26 }
  0xf1   : > { %v771_v41 = vrot.slane %v695_v36, 7  ;;  %v892_v42 = vsel %vm889_vm13, %v890_v30, %v891_v31  ;;  %vm658_vm6 = vcmp.gt.f32.partialorder %v596_v32, 0.0  ;;  %3195 = vmatmul.mubr.msk.f32.vlgmr.msra.gmra.mxu1 %vm957_vm12, %v853_v37  ;;  %v3179_v43 = vpop.f32.mrf.mxu0  ;;  %v678_v44 = vmul.f32 0.01, %v596_v32 }
  0xf2   : > { %3246 = vmatprep.mubr.msk.f32.mxu0 %vm957_vm12, %v892_v42  ;;  %3219 = vmatpush3.msk.msra.mxu1 %vm990_vm2, %v3667_v23  ;;  %v894_v45 = vsel %vm889_vm13, %v891_v31, %v893_v60  ;;  %v591_v47 = vadd.f32 %v3683_v25, %v590_v33  ;;  %v854_v48 = vrot.slane %v3736_v20, 1  ;;  %v3771_v50 = vsel %vm761_vm4, %v772_v29, 0.0 }
  0xf3   : > { %v3774_v51 = vsel %vm761_vm4, %v771_v41, %v772_v29  ;;  %3247 = vmatmul.mubr.msk.f32.vlgmr.msra.gmra.mxu0 %vm957_vm12, %v894_v45  ;;  %v855_v23 = vrot.slane %v3733_v19, 1  ;;  %v895_v52 = vrot.slane %v3736_v20, 2  ;;  %v600_v53 = vpop.f32.mrf.mxu0  ;;  %3270 = vmatprep.subr.msk.mxu1 %vm990_vm2, %v3752_v38  ;;  %v698_v55 = vsel %vm658_vm6, %v596_v32, %v678_v44 }
  0xf4   : > { %vm657_vm9 = vcmp.gt.f32.partialorder %v591_v47, 0.0  ;;  %v677_v56 = vmul.f32 0.01, %v591_v47  ;;  %v896_v57 = vrot.slane %v3733_v19, 2  ;;  %3297 = vmatpush3.msk.msra.mxu0 %vm990_vm2, %v3674_v24  ;;  %v775_v58 = vrot.slane %v698_v55, 7 }
  0xf5   : > { %v3786_v59 = vsel %vm848_vm7, %v854_v48, %v855_v23  ;;  %v606_v60 = vadd.f32 %v3179_v43, %v3683_v25  ;;  %v857_v61 = vrot.slane %v3730_v18, 1  ;;  %v3182_v0 = vpop.f32.mrf.mxu0  ;;  %3348 = vmatprep.subr.msk.mxu0 %vm990_vm2, %v3768_v49  ;;  %v898_v24 = vrot.slane %v3730_v18, 2 }
  0xf6   : > { %v697_v1 = vsel %vm657_vm9, %v591_v47, %v677_v56  ;;  %3197 = vmatprep.mubr.msk.f32.mxu1 %vm957_vm12, %v3786_v59  ;;  %v3795_v2 = vsel %vm889_vm13, %v895_v52, %v896_v57  ;;  %v601_v3 = vadd.f32 %v3683_v25, %v600_v53  ;;  %v3800_v4 = vsel %vm761_vm4, 0.0, %v771_v41 }
  0xf7   : > { %v774_v6 = vrot.slane %v697_v1, 7  ;;  %3249 = vmatprep.mubr.msk.f32.mxu0 %vm957_vm12, %v3795_v2  ;;  %vm660_vm10 = vcmp.gt.f32.partialorder %v606_v60, 0.0  ;;  %v680_v7 = vmul.f32 0.01, %v606_v60  ;;  %v3805_v8 = vsel %vm848_vm7, %v855_v23, %v857_v61  ;;  %v610_v11 = vpop.f32.mrf.mxu0 }
  0xf8   : > { %v3808_v9 = vsel %vm889_vm13, %v896_v57, %v898_v24  ;;  %vm659_vm11 = vcmp.gt.f32.partialorder %v601_v3, 0.0  ;;  %v679_v10 = vmul.f32 0.01, %v601_v3  ;;  %v3811_v12 = vsel %vm761_vm4, %v775_v58, 0.0  ;;  %3198 = vmatmul.mubr.msk.f32.gmra.mxu1 %vm957_vm12, %v3805_v8 }
  0xf9   : > { %v3814_v13 = vsel %vm761_vm4, %v774_v6, %v775_v58  ;;  %v700_v14 = vsel %vm660_vm10, %v606_v60, %v680_v7  ;;  %3250 = vmatmul.mubr.msk.f32.gmra.mxu0 %vm957_vm12, %v3808_v9  ;;  %v859_v15 = vrot.slane %v3755_v40, 1  ;;  %v860_v18 = vrot.slane %v3746_v35, 1  ;;  %v3185_v33 = vpop.f32.mrf.mxu0 }
  0xfa   : > { %v778_v16 = vrot.slane %v700_v14, 7  ;;  %v699_v17 = vsel %vm659_vm11, %v601_v3, %v679_v10  ;;  %v900_v21 = vrot.slane %v3755_v40, 2  ;;  %v3824_v22 = vsel %vm761_vm4, 0.0, %v774_v6 }
  0xfb   : > { %v777_v26 = vrot.slane %v699_v17, 7  ;;  %v901_v27 = vrot.slane %v3746_v35, 2  ;;  %v616_v28 = vadd.f32 %v3182_v0, %v3683_v25  ;;  %v3829_v29 = vsel %vm848_vm7, %v859_v15, %v860_v18  ;;  %v620_v56 = vpop.f32.mrf.mxu0 }
  0xfc   : > { %v862_v30 = vrot.slane %v3743_v34, 1  ;;  %v903_v31 = vrot.slane %v3743_v34, 2  ;;  %v611_v32 = vadd.f32 %v3683_v25, %v610_v11  ;;  %v3835_v36 = vsel %vm761_vm4, %v778_v16, 0.0  ;;  %3200 = vmatprep.mubr.msk.f32.mxu1 %vm957_vm12, %v3829_v29 }
  0xfd   : > { %v3838_v37 = vsel %vm761_vm4, %v777_v26, %v778_v16  ;;  %v3843_v41 = vsel %vm889_vm13, %v900_v21, %v901_v27  ;;  %vm662_vm14 = vcmp.gt.f32.partialorder %v616_v28, 0.0  ;;  %v682_v34 = vmul.f32 0.01, %v616_v28 }
  0xfe   : > { %3252 = vmatprep.mubr.msk.f32.mxu0 %vm957_vm12, %v3843_v41  ;;  %v3848_v42 = vsel %vm848_vm7, %v860_v18, %v862_v30  ;;  %v3851_v43 = vsel %vm889_vm13, %v901_v27, %v903_v31  ;;  %vm661_vm15 = vcmp.gt.f32.partialorder %v611_v32, 0.0  ;;  %v681_v44 = vmul.f32 0.01, %v611_v32 }
  0xff   : > { %3201 = vmatmul.mubr.msk.f32.gmra.mxu1 %vm957_vm12, %v3848_v42  ;;  %3253 = vmatmul.mubr.msk.f32.gmra.mxu0 %vm957_vm12, %v3851_v43  ;;  %v864_v45 = vrot.slane %v3800_v4, 1  ;;  %v865_v47 = vrot.slane %v3774_v51, 1  ;;  %v905_v48 = vrot.slane %v3800_v4, 2  ;;  %v702_v23 = vsel %vm662_vm14, %v616_v28, %v682_v34 }
 0x100   : > { %v906_v52 = vrot.slane %v3774_v51, 2  ;;  %v626_v53 = vadd.f32 %v3185_v33, %v3683_v25  ;;  %v867_v55 = vrot.slane %v3771_v50, 1  ;;  %v781_v57 = vrot.slane %v702_v23, 7 }
 0x101   : > { %v701_v58 = vsel %vm661_vm15, %v611_v32, %v681_v44  ;;  %v3864_v60 = vsel %vm848_vm7, %v864_v45, %v865_v47  ;;  %v908_v61 = vrot.slane %v3771_v50, 2  ;;  %v3873_v3 = vsel %vm761_vm4, 0.0, %v777_v26 }
 0x102   : > { %v780_v0 = vrot.slane %v701_v58, 7  ;;  %3203 = vmatprep.mubr.msk.f32.mxu1 %vm957_vm12, %v3864_v60  ;;  %v3870_v1 = vsel %vm889_vm13, %v905_v48, %v906_v52  ;;  %vm664_vm0 = vcmp.gt.f32.partialorder %v626_v53, 0.0  ;;  %v684_v24 = vmul.f32 0.01, %v626_v53 }
 0x103   : > { %3255 = vmatprep.mubr.msk.f32.mxu0 %vm957_vm12, %v3870_v1  ;;  %v3878_v6 = vsel %vm848_vm7, %v865_v47, %v867_v55  ;;  %v3881_v50 = vsel %vm889_vm13, %v906_v52, %v908_v61  ;;  %v621_v7 = vadd.f32 %v3683_v25, %v620_v56  ;;  %v828_v10 = vsel %vm761_vm4, %v781_v57, 0.0 }
 0x104   : > { %v3886_v11 = vsel %vm761_vm4, %v780_v0, %v781_v57  ;;  %v704_v14 = vsel %vm664_vm0, %v626_v53, %v684_v24  ;;  %3204 = vmatmul.mubr.msk.f32.gmra.mxu1 %vm957_vm12, %v3878_v6  ;;  %3256 = vmatmul.mubr.msk.f32.gmra.mxu0 %vm957_vm12, %v3881_v50  ;;  %v869_v15 = vrot.slane %v3824_v22, 1  ;;  %v3894_v16 = vsel %vm761_vm4, 0.0, %v780_v0  ;;  %v3188_v53 = vpop.f32.mrf.mxu0 }
 0x105   : > { %vm663_vm3 = vcmp.gt.f32.partialorder %v621_v7, 0.0  ;;  %v683_v17 = vmul.f32 0.01, %v621_v7  ;;  %v870_v18 = vrot.slane %v3814_v13, 1  ;;  %v910_v21 = vrot.slane %v3824_v22, 2 }
 0x106   : > { %v911_v26 = vrot.slane %v3814_v13, 2  ;;  %v872_v27 = vrot.slane %v3811_v12, 1  ;;  %v913_v28 = vrot.slane %v3811_v12, 2  ;;  %v784_v30 = vrot.slane %v704_v14, 7 }
 0x107   : > { %v703_v31 = vsel %vm663_vm3, %v621_v7, %v683_v17  ;;  %v3902_v32 = vsel %vm848_vm7, %v869_v15, %v870_v18  ;;  %v874_v33 = vrot.slane %v3873_v3, 1  ;;  %v875_v12 = vrot.slane %v3838_v37, 1 }
 0x108   : > { %v783_v34 = vrot.slane %v703_v31, 7  ;;  %3206 = vmatprep.mubr.msk.f32.mxu1 %vm957_vm12, %v3902_v32  ;;  %v3908_v44 = vsel %vm889_vm13, %v910_v21, %v911_v26  ;;  %v3911_v45 = vsel %vm848_vm7, %v870_v18, %v872_v27  ;;  %v3914_v47 = vsel %vm889_vm13, %v911_v26, %v913_v28  ;;  %v630_v28 = vpop.f32.mrf.mxu0 }
 0x109   : > { %3258 = vmatprep.mubr.msk.f32.mxu0 %vm957_vm12, %v3908_v44  ;;  %3207 = vmatmul.mubr.msk.f32.gmra.mxu1 %vm957_vm12, %v3911_v45  ;;  %v915_v48 = vrot.slane %v3873_v3, 2  ;;  %v916_v23 = vrot.slane %v3838_v37, 2  ;;  %v877_v52 = vrot.slane %v3835_v36, 1  ;;  %v918_v57 = vrot.slane %v3835_v36, 2 }
 0x10a   : > { %v3925_v55 = vsel %vm761_vm4, %v783_v34, %v784_v30  ;;  %v3928_v56 = vsel %vm761_vm4, 0.0, %v783_v34  ;;  %3259 = vmatmul.mubr.msk.f32.gmra.mxu0 %vm957_vm12, %v3914_v47  ;;  %v879_v58 = vrot.slane %v3894_v16, 1  ;;  %v829_v61 = vsel %vm761_vm4, %v784_v30, 0.0 }
 0x10b   : > { %v3936_v0 = vsel %vm848_vm7, %v874_v33, %v875_v12  ;;  %v3939_v24 = vsel %vm889_vm13, %v915_v48, %v916_v23  ;;  %v880_v7 = vrot.slane %v3886_v11, 1  ;;  %v3947_v36 = vsel %vm848_vm7, %v875_v12, %v877_v52 }
 0x10c   : > { %3209 = vmatprep.mubr.msk.f32.mxu1 %vm957_vm12, %v3936_v0  ;;  %3261 = vmatprep.mubr.msk.f32.mxu0 %vm957_vm12, %v3939_v24  ;;  %v3950_v14 = vsel %vm889_vm13, %v916_v23, %v918_v57  ;;  %v920_v15 = vrot.slane %v3894_v16, 2  ;;  %v921_v17 = vrot.slane %v3886_v11, 2  ;;  %v882_v21 = vrot.slane %v828_v10, 1 }
 0x10d   : > { %3210 = vmatmul.mubr.msk.f32.gmra.mxu1 %vm957_vm12, %v3947_v36  ;;  %v3957_v18 = vsel %vm848_vm7, %v879_v58, %v880_v7  ;;  %v884_v26 = vrot.slane %v3928_v56, 1  ;;  %v885_v27 = vrot.slane %v3925_v55, 1  ;;  %v923_v31 = vrot.slane %v828_v10, 2 }
 0x10e   : > { %3262 = vmatmul.mubr.msk.f32.gmra.mxu0 %vm957_vm12, %v3950_v14  ;;  %3212 = vmatprep.mubr.msk.f32.mxu1 %vm957_vm12, %v3957_v18  ;;  %v3966_v30 = vsel %vm889_vm13, %v920_v15, %v921_v17  ;;  %v925_v33 = vrot.slane %v3928_v56, 2  ;;  %v926_v34 = vrot.slane %v3925_v55, 2  ;;  %v3973_v12 = vsel %vm848_vm7, %v880_v7, %v882_v21 }
 0x10f   : > { %3264 = vmatprep.mubr.msk.f32.mxu0 %vm957_vm12, %v3966_v30  ;;  %v3976_v48 = vsel %vm848_vm7, %v884_v26, %v885_v27  ;;  %v3979_v23 = vsel %vm889_vm13, %v921_v17, %v923_v31  ;;  %v636_v10 = vadd.f32 %v3188_v53, %v3683_v25  ;;  %v631_v57 = vadd.f32 %v3683_v25, %v630_v28 }
 0x110   : > { %v3982_v52 = vsel %vm889_vm13, %v925_v33, %v926_v34  ;;  %v887_v58 = vrot.slane %v829_v61, 1  ;;  %v928_v15 = vrot.slane %v829_v61, 2  ;;  %v790_v7 = vrot.slane %v740_v54, 7 }
 0x111   : > { %3213 = vmatmul.mubr.msk.f32.gmra.mxu1 %vm957_vm12, %v3973_v12  ;;  %v739_v17 = vsel %vm3692_vm8, 0.0, %v3715_v62  ;;  %vm666_vm5 = vcmp.gt.f32.partialorder %v636_v10, 0.0  ;;  %v686_v25 = vmul.f32 0.01, %v636_v10  ;;  %vm665_vm6 = vcmp.gt.f32.partialorder %v631_v57, 0.0 }
 0x112   : > { %3265 = vmatmul.mubr.msk.f32.gmra.mxu0 %vm957_vm12, %v3979_v23  ;;  %3215 = vmatprep.mubr.msk.f32.mxu1 %vm957_vm12, %v3976_v48  ;;  %v685_v53 = vmul.f32 0.01, %v631_v57  ;;  %v4002_v46 = vsel %vm848_vm7, %v885_v27, %v887_v58  ;;  %v831_v54 = vsel %vm761_vm4, %v790_v7, 0.0  ;;  %v789_v39 = vrot.slane %v739_v17, 7 }
 0x113   : > { %3267 = vmatprep.mubr.msk.f32.mxu0 %vm957_vm12, %v3982_v52  ;;  %v4006_v62 = vsel %vm889_vm13, %v926_v34, %v928_v15  ;;  %v706_v61 = vsel %vm666_vm5, %v636_v10, %v686_v25  ;;  %v952_v26 = vrot.slane %v831_v54, 2 }
 0x114   : > { %4621 = vst [vmem:[#allocation2_spill] sm:$0xff] %v4006_v62  ;;  %v705_v21 = vsel %vm665_vm6, %v631_v57, %v685_v53  ;;  %v787_v28 = vrot.slane %v706_v61, 7  ;;  %v4011_v33 = vsel %vm761_vm4, 0.0, %v789_v39  ;;  %v4014_v27 = vsel %vm761_vm4, %v789_v39, %v790_v7 }
 0x115   : > { %3216 = vmatmul.mubr.msk.f32.gmra.mxu1 %vm957_vm12, %v4002_v46  ;;  %v786_v31 = vrot.slane %v705_v21, 7  ;;  %v944_v34 = vrot.slane %v4011_v33, 1  ;;  %v949_v10 = vrot.slane %v4011_v33, 2  ;;  %v945_v57 = vrot.slane %v4014_v27, 1 }
 0x116   : > { %3268 = vmatmul.mubr.msk.f32.gmra.mxu0 %vm957_vm12, %v4006_v62  ;;  %3220 = vmatprep.mubr.msk.f32.mxu1 %vm957_vm12, %v3718_v63  ;;  %v950_v58 = vrot.slane %v4014_v27, 2  ;;  %v830_v15 = vsel %vm761_vm4, %v787_v28, 0.0  ;;  %v947_v63 = vrot.slane %v831_v54, 1 }
 0x117   : > { %3298 = vmatprep.mubr.msk.f32.mxu0 %vm957_vm12, %v3786_v59  ;;  %v4028_v7 = vsel %vm761_vm4, %v786_v31, %v787_v28  ;;  %v4031_v17 = vsel %vm761_vm4, 0.0, %v786_v31  ;;  %v935_v39 = vrot.slane %v830_v15, 1  ;;  %v2911_v59 = vld [vmem:[%s4612_s5 + $0xa] sm:$0x3]  ;;  %v940_v28 = vrot.slane %v830_v15, 2 }
 0x118   : > { %v932_v25 = vrot.slane %v4031_v17, 1  ;;  %v933_v53 = vrot.slane %v4028_v7, 1  ;;  %v937_v61 = vrot.slane %v4031_v17, 2  ;;  %v938_v21 = vrot.slane %v4028_v7, 2 }
 0x119   : > { %3221 = vmatmul.mubr.msk.f32.vlgmr.msra.gmra.mxu1 %vm957_vm12, %v3722_v5  ;;  %v4043_v31 = vsel %vm889_vm13, %v949_v10, %v950_v58  ;;  %v4046_v54 = vsel %vm889_vm13, %v950_v58, %v952_v26  ;;  %v2965_v10 = vld [vmem:[%s4612_s5 + $0x10] sm:$0x3]  ;;  %v4062_v15 = vsel %vm848_vm7, %v944_v34, %v945_v57  ;;  %v4075_v26 = vsel %vm848_vm7, %v945_v57, %v947_v63 }
 0x11a   : > { %3271 = vmatpush3.msk.msra.mxu1 %vm990_vm2, %v3752_v38  ;;  %3299 = vmatmul.mubr.msk.f32.vlgmr.msra.gmra.mxu0 %vm957_vm12, %v3805_v8  ;;  %v4053_v5 = vsel %vm848_vm7, %v932_v25, %v933_v53  ;;  %v4056_v62 = vsel %vm848_vm7, %v933_v53, %v935_v39  ;;  %v4069_v38 = vsel %vm889_vm13, %v937_v61, %v938_v21 }
 0x11b   : > { %3223 = vmatprep.mubr.msk.f32.mxu1 %vm957_vm12, %v3736_v20  ;;  %3301 = vmatprep.mubr.msk.f32.mxu0 %vm957_vm12, %v3829_v29  ;;  %v4072_v8 = vsel %vm889_vm13, %v938_v21, %v940_v28 }
 0x11c   : > { %3322 = vmatprep.subr.msk.mxu1 %vm990_vm2, %v2911_v59  ;;  %3349 = vmatpush3.msk.msra.mxu0 %vm990_vm2, %v3768_v49  ;;  %v2947_v49 = vld [vmem:[%s4612_s5 + $0xe] sm:$0x3] }
 0x11d   : > { %3224 = vmatmul.mubr.msk.f32.gmra.mxu1 %vm957_vm12, %v3733_v19  ;;  %3400 = vmatprep.subr.msk.mxu0 %vm990_vm2, %v2965_v10 }
 0x11e   : > { %3302 = vmatmul.mubr.msk.f32.gmra.mxu0 %vm957_vm12, %v3848_v42  ;;  %3226 = vmatprep.mubr.msk.f32.mxu1 %vm957_vm12, %v3755_v40 }
 0x11f   : > { %3304 = vmatprep.mubr.msk.f32.mxu0 %vm957_vm12, %v3864_v60 }
 0x121   : > { %3227 = vmatmul.mubr.msk.f32.gmra.mxu1 %vm957_vm12, %v3746_v35 }
 0x122   : > { %3305 = vmatmul.mubr.msk.f32.gmra.mxu0 %vm957_vm12, %v3878_v6  ;;  %3229 = vmatprep.mubr.msk.f32.mxu1 %vm957_vm12, %v3800_v4 }
 0x123   : > { %3307 = vmatprep.mubr.msk.f32.mxu0 %vm957_vm12, %v3902_v32 }
 0x125   : > { %3230 = vmatmul.mubr.msk.f32.gmra.mxu1 %vm957_vm12, %v3774_v51 }
 0x126   : > { %3308 = vmatmul.mubr.msk.f32.gmra.mxu0 %vm957_vm12, %v3911_v45  ;;  %3232 = vmatprep.mubr.msk.f32.mxu1 %vm957_vm12, %v3824_v22 }
 0x127   : > { %3310 = vmatprep.mubr.msk.f32.mxu0 %vm957_vm12, %v3936_v0 }
 0x129   : > { %3233 = vmatmul.mubr.msk.f32.gmra.mxu1 %vm957_vm12, %v3814_v13 }
 0x12a   : > { %3311 = vmatmul.mubr.msk.f32.gmra.mxu0 %vm957_vm12, %v3947_v36  ;;  %3235 = vmatprep.mubr.msk.f32.mxu1 %vm957_vm12, %v3873_v3 }
 0x12b   : > { %3313 = vmatprep.mubr.msk.f32.mxu0 %vm957_vm12, %v3957_v18 }
 0x12d   : > { %3236 = vmatmul.mubr.msk.f32.gmra.mxu1 %vm957_vm12, %v3838_v37 }
 0x12e   : > { %3314 = vmatmul.mubr.msk.f32.gmra.mxu0 %vm957_vm12, %v3973_v12  ;;  %3238 = vmatprep.mubr.msk.f32.mxu1 %vm957_vm12, %v3894_v16 }
 0x12f   : > { %3316 = vmatprep.mubr.msk.f32.mxu0 %vm957_vm12, %v3976_v48 }
 0x131   : > { %3239 = vmatmul.mubr.msk.f32.gmra.mxu1 %vm957_vm12, %v3886_v11 }
 0x132   : > { %3317 = vmatmul.mubr.msk.f32.gmra.mxu0 %vm957_vm12, %v4002_v46  ;;  %3241 = vmatprep.mubr.msk.f32.mxu1 %vm957_vm12, %v3928_v56 }
 0x133   : > { %3319 = vmatprep.mubr.msk.f32.mxu0 %vm957_vm12, %v4053_v5 }
 0x135   : > { %3242 = vmatmul.mubr.msk.f32.gmra.mxu1 %vm957_vm12, %v3925_v55 }
 0x136   : > { %3320 = vmatmul.mubr.msk.f32.gmra.mxu0 %vm957_vm12, %v4056_v62  ;;  %3272 = vmatprep.mubr.msk.f32.mxu1 %vm957_vm12, %v3736_v20 }
 0x137   : > { %3350 = vmatprep.mubr.msk.f32.mxu0 %vm957_vm12, %v3755_v40 }
 0x139   : > { %3273 = vmatmul.mubr.msk.f32.vlgmr.msra.gmra.mxu1 %vm957_vm12, %v3733_v19  ;;  %v4622_v19 = vld [vmem:[#allocation2_spill] sm:$0xff] }
 0x13a   : > { %3323 = vmatpush3.msk.msra.mxu1 %vm990_vm2, %v2911_v59  ;;  %3351 = vmatmul.mubr.msk.f32.vlgmr.msra.gmra.mxu0 %vm957_vm12, %v3746_v35 }
 0x13b   : > { %3275 = vmatprep.mubr.msk.f32.mxu1 %vm957_vm12, %v3755_v40  ;;  %3353 = vmatprep.mubr.msk.f32.mxu0 %vm957_vm12, %v3800_v4 }
 0x13c   : > { %3374 = vmatprep.subr.msk.mxu1 %vm990_vm2, %v2947_v49  ;;  %3401 = vmatpush3.msk.msra.mxu0 %vm990_vm2, %v2965_v10 }
 0x13d   : > { %3276 = vmatmul.mubr.msk.f32.gmra.mxu1 %vm957_vm12, %v3746_v35 }
 0x13e   : > { %3354 = vmatmul.mubr.msk.f32.gmra.mxu0 %vm957_vm12, %v3774_v51  ;;  %3278 = vmatprep.mubr.msk.f32.mxu1 %vm957_vm12, %v3800_v4 }
 0x13f   : > { %3356 = vmatprep.mubr.msk.f32.mxu0 %vm957_vm12, %v3824_v22 }
 0x141   : > { %3279 = vmatmul.mubr.msk.f32.gmra.mxu1 %vm957_vm12, %v3774_v51 }
 0x142   : > { %3357 = vmatmul.mubr.msk.f32.gmra.mxu0 %vm957_vm12, %v3814_v13  ;;  %3281 = vmatprep.mubr.msk.f32.mxu1 %vm957_vm12, %v3824_v22 }
 0x143   : > { %3359 = vmatprep.mubr.msk.f32.mxu0 %vm957_vm12, %v3873_v3 }
 0x145   : > { %3282 = vmatmul.mubr.msk.f32.gmra.mxu1 %vm957_vm12, %v3814_v13 }
 0x146   : > { %3360 = vmatmul.mubr.msk.f32.gmra.mxu0 %vm957_vm12, %v3838_v37  ;;  %3284 = vmatprep.mubr.msk.f32.mxu1 %vm957_vm12, %v3873_v3 }
 0x147   : > { %3362 = vmatprep.mubr.msk.f32.mxu0 %vm957_vm12, %v3894_v16 }
 0x149   : > { %3285 = vmatmul.mubr.msk.f32.gmra.mxu1 %vm957_vm12, %v3838_v37 }
 0x14a   : > { %3363 = vmatmul.mubr.msk.f32.gmra.mxu0 %vm957_vm12, %v3886_v11  ;;  %3287 = vmatprep.mubr.msk.f32.mxu1 %vm957_vm12, %v3894_v16 }
 0x14b   : > { %3365 = vmatprep.mubr.msk.f32.mxu0 %vm957_vm12, %v3928_v56 }
 0x14d   : > { %3288 = vmatmul.mubr.msk.f32.gmra.mxu1 %vm957_vm12, %v3886_v11 }
 0x14e   : > { %3366 = vmatmul.mubr.msk.f32.gmra.mxu0 %vm957_vm12, %v3925_v55  ;;  %3290 = vmatprep.mubr.msk.f32.mxu1 %vm957_vm12, %v3928_v56 }
 0x14f   : > { %3368 = vmatprep.mubr.msk.f32.mxu0 %vm957_vm12, %v4031_v17 }
 0x151   : > { %3291 = vmatmul.mubr.msk.f32.gmra.mxu1 %vm957_vm12, %v3925_v55 }
 0x152   : > { %3369 = vmatmul.mubr.msk.f32.gmra.mxu0 %vm957_vm12, %v4028_v7  ;;  %3293 = vmatprep.mubr.msk.f32.mxu1 %vm957_vm12, %v4031_v17 }
 0x153   : > { %3371 = vmatprep.mubr.msk.f32.mxu0 %vm957_vm12, %v4011_v33 }
 0x155   : > { %3294 = vmatmul.mubr.msk.f32.gmra.mxu1 %vm957_vm12, %v4028_v7 }
 0x156   : > { %3372 = vmatmul.mubr.msk.f32.gmra.mxu0 %vm957_vm12, %v4014_v27  ;;  %3324 = vmatprep.mubr.msk.f32.mxu1 %vm957_vm12, %v3795_v2 }
 0x157   : > { %3402 = vmatprep.mubr.msk.f32.mxu0 %vm957_vm12, %v3843_v41 }
 0x159   : > { %3325 = vmatmul.mubr.msk.f32.vlgmr.msra.gmra.mxu1 %vm957_vm12, %v3808_v9 }
 0x15a   : > { %3375 = vmatpush3.msk.msra.mxu1 %vm990_vm2, %v2947_v49  ;;  %3403 = vmatmul.mubr.msk.f32.vlgmr.msra.gmra.mxu0 %vm957_vm12, %v3851_v43 }
 0x15b   : > { %3327 = vmatprep.mubr.msk.f32.mxu1 %vm957_vm12, %v3843_v41  ;;  %3405 = vmatprep.mubr.msk.f32.mxu0 %vm957_vm12, %v3870_v1 }
 0x15d   : > { %3328 = vmatmul.mubr.msk.f32.gmra.mxu1 %vm957_vm12, %v3851_v43 }
 0x15e   : > { %3406 = vmatmul.mubr.msk.f32.gmra.mxu0 %vm957_vm12, %v3881_v50  ;;  %3330 = vmatprep.mubr.msk.f32.mxu1 %vm957_vm12, %v3870_v1 }
 0x15f   : > { %3408 = vmatprep.mubr.msk.f32.mxu0 %vm957_vm12, %v3908_v44 }
 0x161   : > { %3331 = vmatmul.mubr.msk.f32.gmra.mxu1 %vm957_vm12, %v3881_v50 }
 0x162   : > { %3409 = vmatmul.mubr.msk.f32.gmra.mxu0 %vm957_vm12, %v3914_v47  ;;  %3333 = vmatprep.mubr.msk.f32.mxu1 %vm957_vm12, %v3908_v44 }
 0x163   : > { %3411 = vmatprep.mubr.msk.f32.mxu0 %vm957_vm12, %v3939_v24 }
 0x165   : > { %3334 = vmatmul.mubr.msk.f32.gmra.mxu1 %vm957_vm12, %v3914_v47 }
 0x166   : > { %3412 = vmatmul.mubr.msk.f32.gmra.mxu0 %vm957_vm12, %v3950_v14  ;;  %3336 = vmatprep.mubr.msk.f32.mxu1 %vm957_vm12, %v3939_v24 }
 0x167   : > { %3414 = vmatprep.mubr.msk.f32.mxu0 %vm957_vm12, %v3966_v30 }
 0x169   : > { %3337 = vmatmul.mubr.msk.f32.gmra.mxu1 %vm957_vm12, %v3950_v14 }
 0x16a   : > { %3415 = vmatmul.mubr.msk.f32.gmra.mxu0 %vm957_vm12, %v3979_v23  ;;  %3339 = vmatprep.mubr.msk.f32.mxu1 %vm957_vm12, %v3966_v30 }
 0x16b   : > { %3417 = vmatprep.mubr.msk.f32.mxu0 %vm957_vm12, %v3982_v52 }
 0x16d   : > { %3340 = vmatmul.mubr.msk.f32.gmra.mxu1 %vm957_vm12, %v3979_v23 }
 0x16e   : > { %3418 = vmatmul.mubr.msk.f32.gmra.mxu0 %vm957_vm12, %v4622_v19  ;;  %3342 = vmatprep.mubr.msk.f32.mxu1 %vm957_vm12, %v3982_v52 }
 0x16f   : > { %3420 = vmatprep.mubr.msk.f32.mxu0 %vm957_vm12, %v4069_v38 }
 0x171   : > { %3343 = vmatmul.mubr.msk.f32.gmra.mxu1 %vm957_vm12, %v4622_v19 }
 0x172   : > { %3421 = vmatmul.mubr.msk.f32.gmra.mxu0 %vm957_vm12, %v4072_v8  ;;  %3345 = vmatprep.mubr.msk.f32.mxu1 %vm957_vm12, %v4069_v38 }
 0x173   : > { %3423 = vmatprep.mubr.msk.f32.mxu0 %vm957_vm12, %v4043_v31 }
 0x175   : > { %3346 = vmatmul.mubr.msk.f32.gmra.mxu1 %vm957_vm12, %v4072_v8 }
 0x176   : > { %3424 = vmatmul.mubr.msk.f32.gmra.mxu0 %vm957_vm12, %v4046_v54  ;;  %3376 = vmatprep.mubr.msk.f32.mxu1 %vm957_vm12, %v3829_v29 }
 0x179   : > { %3377 = vmatmul.mubr.msk.f32.vlgmr.msra.gmra.mxu1 %vm957_vm12, %v3848_v42 }
 0x17a   : > { %3379 = vmatprep.mubr.msk.f32.mxu1 %vm957_vm12, %v3864_v60 }
 0x17d   : > { %3380 = vmatmul.mubr.msk.f32.gmra.mxu1 %vm957_vm12, %v3878_v6 }
 0x17e   : > { %3382 = vmatprep.mubr.msk.f32.mxu1 %vm957_vm12, %v3902_v32 }
 0x181   : > { %3383 = vmatmul.mubr.msk.f32.gmra.mxu1 %vm957_vm12, %v3911_v45 }
 0x182   : > { %3385 = vmatprep.mubr.msk.f32.mxu1 %vm957_vm12, %v3936_v0 }
 0x185   : > { %3386 = vmatmul.mubr.msk.f32.gmra.mxu1 %vm957_vm12, %v3947_v36 }
 0x186   : > { %3388 = vmatprep.mubr.msk.f32.mxu1 %vm957_vm12, %v3957_v18 }
 0x189   : > { %3389 = vmatmul.mubr.msk.f32.gmra.mxu1 %vm957_vm12, %v3973_v12 }
 0x18a   : > { %3391 = vmatprep.mubr.msk.f32.mxu1 %vm957_vm12, %v3976_v48 }
 0x18d   : > { %3392 = vmatmul.mubr.msk.f32.gmra.mxu1 %vm957_vm12, %v4002_v46 }
 0x18e   : > { %3394 = vmatprep.mubr.msk.f32.mxu1 %vm957_vm12, %v4053_v5 }
 0x191   : > { %3395 = vmatmul.mubr.msk.f32.gmra.mxu1 %vm957_vm12, %v4056_v62 }
 0x192   : > { %3397 = vmatprep.mubr.msk.f32.mxu1 %vm957_vm12, %v4062_v15 }
 0x195   : > { %3398 = vmatmul.mubr.msk.f32.gmra.mxu1 %vm957_vm12, %v4075_v26 }
 0x1b1   : > { %v3196_v20 = vpop.f32.mrf.mxu1 }
 0x1b3   : > { %v3248_v35 = vpop.f32.mrf.mxu0  ;;  %v1060_v40 = vpop.f32.mrf.mxu1 }
 0x1b5   : > { %v1422_v51 = vpop.f32.mrf.mxu0 }
 0x1b8   : > { %v3199_v2 = vpop.f32.mrf.mxu1 }
 0x1b9   : > { %v3251_v4 = vpop.f32.mrf.mxu0 }
 0x1ba   : > { %v1070_v9 = vpop.f32.mrf.mxu1 }
 0x1bb   : > { %v1432_v13 = vpop.f32.mrf.mxu0 }
 0x1bf   : > { %v3202_v22 = vpop.f32.mrf.mxu1  ;;  %v3254_v29 = vpop.f32.mrf.mxu0 }
 0x1c1   : > { %v1080_v37 = vpop.f32.mrf.mxu1  ;;  %v1442_v41 = vpop.f32.mrf.mxu0 }
 0x1c4   : > { %v3205_v42 = vpop.f32.mrf.mxu1  ;;  %v3257_v43 = vpop.f32.mrf.mxu0 }
 0x1c6   : > { %v1090_v60 = vpop.f32.mrf.mxu1  ;;  %v1452_v1 = vpop.f32.mrf.mxu0 }
 0x1c9   : > { %v3208_v3 = vpop.f32.mrf.mxu1 }
 0x1ca   : > { %v3260_v6 = vpop.f32.mrf.mxu0 }
 0x1cb   : > { %v1100_v50 = vpop.f32.mrf.mxu1 }
 0x1cc   : > { %v1462_v11 = vpop.f32.mrf.mxu0 }
 0x1cd   : > { %v3211_v16 = vpop.f32.mrf.mxu1 }
 0x1ce   : > { %v3263_v32 = vpop.f32.mrf.mxu0 }
 0x1cf   : > { %v1110_v44 = vpop.f32.mrf.mxu1 }
 0x1d0   : > { %v1472_v45 = vpop.f32.mrf.mxu0 }
 0x1d1   : > { %v3214_v47 = vpop.f32.mrf.mxu1 }
 0x1d2   : > { %v3266_v55 = vpop.f32.mrf.mxu0 }
 0x1d3   : > { %v1120_v56 = vpop.f32.mrf.mxu1 }
 0x1d4   : > { %v4300_v0 = vpop.f32.mrf.mxu0 }
 0x1d5   : > { %v3217_v24 = vpop.f32.mrf.mxu1 }
 0x1d6   : > { %v4302_v36 = vpop.f32.mrf.mxu0 }
 0x1d7   : > { %v1130_v14 = vpop.f32.mrf.mxu1 }
 0x1d8   : > { %v4304_v18 = vpop.f32.mrf.mxu0 }
 0x1d9   : > { %v3222_v30 = vpop.f32.mrf.mxu1 }
 0x1da   : > { %v1246_v12 = vadd.f32 %v3222_v30, %v3196_v20  ;;  %v4306_v48 = vpop.f32.mrf.mxu0 }
 0x1db   : > { %v1240_v23 = vpop.f32.mrf.mxu1 }
 0x1dc   : > { %v1241_v52 = vadd.f32 %v1240_v23, %v1060_v40  ;;  %v4308_v46 = vpop.f32.mrf.mxu0  ;;  %v4310_v62 = vadd.f32 %v3248_v35, %v1246_v12 }
 0x1dd   : > { %v3225_v33 = vpop.f32.mrf.mxu1 }
 0x1de   : > { %v1256_v27 = vadd.f32 %v3225_v33, %v3199_v2  ;;  %v4312_v34 = vpop.f32.mrf.mxu0  ;;  %v4314_v57 = vadd.f32 %v1422_v51, %v1241_v52 }
 0x1df   : > { %v1250_v58 = vpop.f32.mrf.mxu1 }
 0x1e0   : > { %v1251_v7 = vadd.f32 %v1250_v58, %v1070_v9  ;;  %v4316_v17 = vpop.f32.mrf.mxu0  ;;  %v4318_v63 = vadd.f32 %v3251_v4, %v1256_v27 }
 0x1e1   : > { %v3228_v25 = vpop.f32.mrf.mxu1 }
 0x1e2   : > { %v1266_v53 = vadd.f32 %v3228_v25, %v3202_v22  ;;  %v4320_v39 = vpop.f32.mrf.mxu0  ;;  %v4322_v61 = vadd.f32 %v1432_v13, %v1251_v7 }
 0x1e3   : > { %v1260_v59 = vpop.f32.mrf.mxu1 }
 0x1e4   : > { %v1261_v21 = vadd.f32 %v1260_v59, %v1080_v37  ;;  %v4324_v28 = vpop.f32.mrf.mxu0  ;;  %v4326_v31 = vadd.f32 %v3254_v29, %v1266_v53 }
 0x1e5   : > { %v3231_v54 = vpop.f32.mrf.mxu1 }
 0x1e6   : > { %v1276_v5 = vadd.f32 %v3231_v54, %v3205_v42  ;;  %v4328_v10 = vpop.f32.mrf.mxu0  ;;  %v4330_v15 = vadd.f32 %v1442_v41, %v1261_v21 }
 0x1e7   : > { %v1270_v38 = vpop.f32.mrf.mxu1 }
 0x1e8   : > { %v1271_v8 = vadd.f32 %v1270_v38, %v1090_v60  ;;  %v4332_v26 = vpop.f32.mrf.mxu0  ;;  %v4334_v49 = vadd.f32 %v3257_v43, %v1276_v5 }
 0x1e9   : > { %v3234_v19 = vpop.f32.mrf.mxu1 }
 0x1ea   : > { %v1286_v20 = vadd.f32 %v3234_v19, %v3208_v3  ;;  %v4336_v35 = vpop.f32.mrf.mxu0  ;;  %v4338_v40 = vadd.f32 %v1452_v1, %v1271_v8 }
 0x1eb   : > { %v1280_v51 = vpop.f32.mrf.mxu1 }
 0x1ec   : > { %v1281_v2 = vadd.f32 %v1280_v51, %v1100_v50  ;;  %v4340_v4 = vpop.f32.mrf.mxu0  ;;  %v4342_v9 = vadd.f32 %v3260_v6, %v1286_v20 }
 0x1ed   : > { %v3237_v13 = vpop.f32.mrf.mxu1 }
 0x1ee   : > { %v1296_v22 = vadd.f32 %v3237_v13, %v3211_v16  ;;  %v4344_v29 = vpop.f32.mrf.mxu0  ;;  %v4346_v37 = vadd.f32 %v1462_v11, %v1281_v2 }
 0x1ef   : > { %v1290_v41 = vpop.f32.mrf.mxu1 }
 0x1f0   : > { %v1291_v42 = vadd.f32 %v1290_v41, %v1110_v44  ;;  %v4348_v43 = vpop.f32.mrf.mxu0  ;;  %v4350_v60 = vadd.f32 %v3263_v32, %v1296_v22 }
 0x1f1   : > { %4623 = vst [vmem:[#allocation2_spill] sm:$0xff] %v4348_v43  ;;  %v3240_v1 = vpop.f32.mrf.mxu1 }
 0x1f2   : > { %v1306_v3 = vadd.f32 %v3240_v1, %v3214_v47  ;;  %v4352_v30 = vpop.f32.mrf.mxu0  ;;  %v4354_v50 = vadd.f32 %v1472_v45, %v1291_v42 }
 0x1f3   : > { %4624 = vst [vmem:[#allocation3_spill] sm:$0xff] %v4352_v30  ;;  %v1300_v6 = vpop.f32.mrf.mxu1 }
 0x1f4   : > { %v1301_v12 = vadd.f32 %v1300_v6, %v1120_v56  ;;  %v4356_v23 = vpop.f32.mrf.mxu0  ;;  %v4358_v16 = vadd.f32 %v3266_v55, %v1306_v3 }
 0x1f5   : > { %4625 = vst [vmem:[#allocation4_spill] sm:$0xff] %v4356_v23  ;;  %v3243_v11 = vpop.f32.mrf.mxu1 }
 0x1f6   : > { %v1316_v52 = vadd.f32 %v3243_v11, %v3217_v24  ;;  %v4360_v33 = vpop.f32.mrf.mxu0  ;;  %v4363_v44 = vadd.f32 %v4300_v0, %v1301_v12 }
 0x1f7   : > { %4626 = vst [vmem:[#allocation5_spill] sm:$0xff] %v4360_v33  ;;  %v1310_v32 = vpop.f32.mrf.mxu1 }
 0x1f8   : > { %v1311_v27 = vadd.f32 %v1310_v32, %v1130_v14  ;;  %v4365_v47 = vpop.f32.mrf.mxu0  ;;  %v4368_v45 = vadd.f32 %v4302_v36, %v1316_v52 }
 0x1f9   : > { %4627 = vst [vmem:[#allocation6_spill] sm:$0xff] %v4365_v47  ;;  %v3274_v58 = vpop.f32.mrf.mxu1 }
 0x1fa   : > { %v4370_v56 = vpop.f32.mrf.mxu0  ;;  %v4373_v55 = vadd.f32 %v4304_v18, %v1311_v27 }
 0x1fb   : > { %v1592_v7 = vpop.f32.mrf.mxu1 }
 0x1fc   : > { %v4375_v24 = vpop.f32.mrf.mxu0 }
 0x1fd   : > { %4628 = vst [vmem:[#allocation7_spill] sm:$0xff] %v4375_v24  ;;  %v3277_v25 = vpop.f32.mrf.mxu1 }
 0x1fe   : > { %v4377_v53 = vpop.f32.mrf.mxu0 }
 0x1ff   : > { %4629 = vst [vmem:[#allocation8_spill] sm:$0xff] %v4377_v53  ;;  %v1602_v0 = vpop.f32.mrf.mxu1 }
 0x200   : > { %v4379_v59 = vpop.f32.mrf.mxu0  ;;  %v1673_v24 = vadd.f32 %v1602_v0, %v4322_v61 }
 0x201   : > { %4630 = vst [vmem:[#allocation9_spill] sm:$0xff] %v4379_v59  ;;  %v3280_v14 = vpop.f32.mrf.mxu1 }
 0x202   : > { %v4381_v21 = vpop.f32.mrf.mxu0 }
 0x203   : > { %4631 = vst [vmem:[#allocation10_spill] sm:$0xff] %v4381_v21  ;;  %v1612_v36 = vpop.f32.mrf.mxu1 }
 0x204   : > { %v4383_v54 = vpop.f32.mrf.mxu0 }
 0x205   : > { %4632 = vst [vmem:[#allocation11_spill] sm:$0xff] %v4383_v54  ;;  %v3283_v5 = vpop.f32.mrf.mxu1 }
 0x206   : > { %v4385_v38 = vpop.f32.mrf.mxu0 }
 0x207   : > { %4633 = vst [vmem:[#allocation12_spill] sm:$0xff] %v4385_v38  ;;  %v1622_v18 = vpop.f32.mrf.mxu1 }
 0x208   : > { %v4387_v8 = vpop.f32.mrf.mxu0 }
 0x209   : > { %4634 = vst [vmem:[#allocation13_spill] sm:$0xff] %v4387_v8  ;;  %v3286_v19 = vpop.f32.mrf.mxu1 }
 0x20a   : > { %v4389_v20 = vpop.f32.mrf.mxu0 }
 0x20b   : > { %4635 = vst [vmem:[#allocation14_spill] sm:$0xff] %v4389_v20  ;;  %v1632_v51 = vpop.f32.mrf.mxu1 }
 0x20c   : > { %v4391_v2 = vpop.f32.mrf.mxu0  ;;  %v1679_v61 = vadd.f32 %v1632_v51, %v4346_v37 }
 0x20d   : > { %4636 = vst [vmem:[#allocation15_spill] sm:$0xff] %v4391_v2  ;;  %v3289_v13 = vpop.f32.mrf.mxu1 }
 0x20e   : > { %v4393_v22 = vpop.f32.mrf.mxu0 }
 0x20f   : > { %4637 = vst [vmem:[#allocation16_spill] sm:$0xff] %v4393_v22  ;;  %v1642_v41 = vpop.f32.mrf.mxu1 }
 0x210   : > { %v4395_v42 = vpop.f32.mrf.mxu0 }
 0x211   : > { %4638 = vst [vmem:[#allocation17_spill] sm:$0xff] %v4395_v42  ;;  %v3292_v1 = vpop.f32.mrf.mxu1 }
 0x212   : > { %v4397_v3 = vpop.f32.mrf.mxu0 }
 0x213   : > { %4639 = vst [vmem:[#allocation18_spill] sm:$0xff] %v4397_v3  ;;  %v1652_v6 = vpop.f32.mrf.mxu1 }
 0x214   : > { %v4399_v12 = vpop.f32.mrf.mxu0 }
 0x215   : > { %4640 = vst [vmem:[#allocation19_spill] sm:$0xff] %v4399_v12  ;;  %v3295_v11 = vpop.f32.mrf.mxu1 }
 0x216   : > { %v4401_v52 = vpop.f32.mrf.mxu0 }
 0x217   : > { %4641 = vst [vmem:[#allocation20_spill] sm:$0xff] %v4401_v52  ;;  %v1662_v32 = vpop.f32.mrf.mxu1 }
 0x218   : > { %v4403_v20 = vpop.f32.mrf.mxu0 }
 0x219   : > { %v3326_v27 = vpop.f32.mrf.mxu1  ;;  %4642 = vst [vmem:[#allocation21_spill] sm:$0xff] %v4403_v20  ;;  %v1672_v20 = vadd.f32 %v3274_v58, %v4310_v62  ;;  %v1675_v62 = vadd.f32 %v1612_v36, %v4330_v15  ;;  %v1678_v58 = vadd.f32 %v3283_v5, %v4334_v49 }
 0x21a   : > { %v4405_v38 = vpop.f32.mrf.mxu0 }
 0x21b   : > { %v1932_v2 = vpop.f32.mrf.mxu1  ;;  %4643 = vst [vmem:[#allocation22_spill] sm:$0xff] %v4405_v38 }
 0x21c   : > { %v4407_v42 = vpop.f32.mrf.mxu0 }
 0x21d   : > { %v3329_v8 = vpop.f32.mrf.mxu1  ;;  %4644 = vst [vmem:[#allocation23_spill] sm:$0xff] %v4407_v42  ;;  %v1671_v42 = vadd.f32 %v1592_v7, %v4314_v57  ;;  %v1680_v57 = vadd.f32 %v3286_v19, %v4342_v9 }
 0x21e   : > { %v4409_v59 = vpop.f32.mrf.mxu0 }
 0x21f   : > { %v1942_v22 = vpop.f32.mrf.mxu1  ;;  %4645 = vst [vmem:[#allocation24_spill] sm:$0xff] %v4409_v59  ;;  %v1674_v59 = vadd.f32 %v3277_v25, %v4318_v63  ;;  %v1841_v63 = vadd.f32 %v4308_v46, %v1671_v42  ;;  %v1848_v46 = vadd.f32 %v4328_v10, %v1678_v58  ;;  %v1850_v36 = vadd.f32 %v4336_v35, %v1680_v57 }
 0x220   : > { %v4411_v33 = vpop.f32.mrf.mxu0 }
 0x221   : > { %v3332_v54 = vpop.f32.mrf.mxu1  ;;  %4646 = vst [vmem:[#allocation25_spill] sm:$0xff] %v4411_v33  ;;  %v1842_v33 = vadd.f32 %v4306_v48, %v1672_v20  ;;  %v1682_v48 = vadd.f32 %v3289_v13, %v4350_v60  ;;  %v2011_v15 = vadd.f32 %v1932_v2, %v1841_v63  ;;  %v1844_v49 = vadd.f32 %v4312_v34, %v1674_v59  ;;  %v4650_v59 = vld [vmem:[#allocation2_spill] sm:$0xff]  ;;  %v4654_v2 = vld [vmem:[#allocation8_spill] sm:$0xff] }
 0x222   : > { %v4418_v53 = vpop.f32.mrf.mxu0  ;;  %v4660_v63 = vld [vmem:[#allocation10_spill] sm:$0xff] }
 0x223   : > { %v1952_v21 = vpop.f32.mrf.mxu1  ;;  %4648 = vst [vmem:[#allocation27_spill] sm:$0xff] %v4418_v53  ;;  %v2012_v7 = vadd.f32 %v3326_v27, %v1842_v33  ;;  %v1845_v33 = vadd.f32 %v4324_v28, %v1675_v62  ;;  %v1852_v28 = vadd.f32 %v4344_v29, %v1682_v48  ;;  %v4661_v48 = vld [vmem:[#allocation11_spill] sm:$0xff] }
 0x224   : > { %v4428_v43 = vpop.f32.mrf.mxu0  ;;  %v4658_v62 = vld [vmem:[#allocation23_spill] sm:$0xff] }
 0x225   : > { %v3335_v3 = vpop.f32.mrf.mxu1  ;;  %v2182_v34 = vadd.f32 %v4370_v56, %v2012_v7 }
 0x226   : > { %v4445_v0 = vpop.f32.mrf.mxu0 }
 0x227   : > { %v1962_v12 = vpop.f32.mrf.mxu1 }
 0x229   : > { %v3338_v47 = vpop.f32.mrf.mxu1 }
 0x22a   : > { %v2020_v42 = vadd.f32 %v3338_v47, %v1850_v36  ;;  %v4664_v36 = vld [vmem:[#allocation13_spill] sm:$0xff] }
 0x22b   : > { %v4413_v52 = vpop.f32.mrf.mxu1 }
 0x22d   : > { %v4415_v23 = vpop.f32.mrf.mxu1 }
 0x22e   : > { %4647 = vst [vmem:[#allocation26_spill] sm:$0xff] %v4415_v23  ;;  %v1676_v23 = vadd.f32 %v3280_v14, %v4326_v31  ;;  %v1681_v31 = vadd.f32 %v1642_v41, %v4354_v50  ;;  %v1684_v14 = vadd.f32 %v3292_v1, %v4358_v16  ;;  %v2014_v50 = vadd.f32 %v3329_v8, %v1844_v49 }
 0x22f   : > { %v4420_v38 = vpop.f32.mrf.mxu1  ;;  %v2015_v8 = vadd.f32 %v1952_v21, %v1845_v33  ;;  %v4656_v21 = vld [vmem:[#allocation5_spill] sm:$0xff]  ;;  %v4663_v33 = vld [vmem:[#allocation24_spill] sm:$0xff] }
 0x230   : > { %4649 = vst [vmem:[#allocation28_spill] sm:$0xff] %v4420_v38  ;;  %v1677_v38 = vadd.f32 %v1622_v18, %v4338_v40  ;;  %v1843_v40 = vadd.f32 %v4316_v17, %v1673_v24  ;;  %v1846_v9 = vadd.f32 %v4320_v39, %v1676_v23  ;;  %v1683_v17 = vadd.f32 %v1652_v6, %v4363_v44  ;;  %v4461_v23 = vpop.f32.mrf.mxu0 }
 0x231   : > { %v4423_v30 = vpop.f32.mrf.mxu1  ;;  %v1686_v24 = vadd.f32 %v3295_v11, %v4368_v45  ;;  %v1849_v39 = vadd.f32 %v4340_v4, %v1679_v61  ;;  %v1851_v16 = vadd.f32 %v4650_v59, %v1681_v31  ;;  %v2018_v44 = vadd.f32 %v3335_v3, %v1848_v46  ;;  %v4468_v4 = vld [vmem:[%s4613_s6] ss:$0 sm:$0xff]  ;;  %v4652_v45 = vld [vmem:[#allocation3_spill] sm:$0xff] }
 0x232   : > { %v1847_v37 = vadd.f32 %v4332_v26, %v1677_v38  ;;  %v1685_v26 = vadd.f32 %v1662_v32, %v4373_v55  ;;  %v4651_v38 = vld [vmem:[#allocation7_spill] sm:$0xff]  ;;  %v2013_v18 = vadd.f32 %v1942_v22, %v1843_v40  ;;  %v2016_v56 = vadd.f32 %v3332_v54, %v1846_v9  ;;  %v4653_v55 = vld [vmem:[#allocation22_spill] sm:$0xff]  ;;  %v4655_v22 = vld [vmem:[#allocation4_spill] sm:$0xff]  ;;  %v4481_v6 = vpop.f32.mrf.mxu0 }
 0x233   : > { %v4434_v53 = vpop.f32.mrf.mxu1  ;;  %v2181_v35 = vadd.f32 %v4651_v38, %v2011_v15  ;;  %v4471_v19 = vadd.f32 %v4652_v45, %v1684_v14  ;;  %v2184_v13 = vadd.f32 %v4654_v2, %v2014_v50  ;;  %v4476_v54 = vadd.f32 %v4655_v22, %v1683_v17  ;;  %v4657_v11 = vld [vmem:[#allocation6_spill] sm:$0xff]  ;;  %v4662_v15 = vld [vmem:[#allocation12_spill] sm:$0xff]  ;;  %v3468_v38 = vld [vmem:[%s3610_s19 + $0x8] sm:$0xff] }
 0x234   : > { %v2017_v41 = vadd.f32 %v1962_v12, %v1847_v37  ;;  %v4479_v1 = vadd.f32 %v4656_v21, %v1686_v24  ;;  %v4484_v32 = vadd.f32 %v4657_v11, %v1685_v26  ;;  %v4659_v12 = vld [vmem:[#allocation9_spill] sm:$0xff]  ;;  %v2186_v61 = vadd.f32 %v4660_v63, %v2016_v56  ;;  %v4665_v17 = vld [vmem:[#allocation14_spill] sm:$0xff] }
 0x235   : > { %v4440_v25 = vpop.f32.mrf.mxu1  ;;  %v2183_v47 = vadd.f32 %v4659_v12, %v2013_v18  ;;  %v2185_v31 = vadd.f32 %v4661_v48, %v2015_v8  ;;  %v2188_v49 = vadd.f32 %v4662_v15, %v2018_v44  ;;  %v2019_v37 = vadd.f32 %v4413_v52, %v1849_v39  ;;  %v4666_v39 = vld [vmem:[#allocation26_spill] sm:$0xff]  ;;  %v4667_v18 = vld [vmem:[#allocation25_spill] sm:$0xff] }
 0x236   : > { %v2190_v24 = vadd.f32 %v4665_v17, %v2020_v42  ;;  %v4669_v42 = vld [vmem:[#allocation15_spill] sm:$0xff] }
 0x237   : > { %v4451_v60 = vpop.f32.mrf.mxu1  ;;  %v2189_v22 = vadd.f32 %v4669_v42, %v2019_v37 }
 0x239   : > { %v3378_v10 = vpop.f32.mrf.mxu1 }
 0x23a   : > { %v2352_v5 = vadd.f32 %v3378_v10, %v2182_v34  ;;  %v2187_v34 = vadd.f32 %v4664_v36, %v2017_v41  ;;  %v4504_v10 = vpop.f32.mrf.mxu0 }
 0x23b   : > { %v2272_v29 = vpop.f32.mrf.mxu1 }
 0x23c   : > { %v2522_v20 = vadd.f32 %v4653_v55, %v2352_v5  ;;  %v2351_v51 = vadd.f32 %v2272_v29, %v2181_v35  ;;  %v2022_v5 = vadd.f32 %v4666_v39, %v1852_v28  ;;  %v3419_v21 = vpop.f32.mrf.mxu0 }
 0x23d   : > { %v3381_v3 = vpop.f32.mrf.mxu1 }
 0x23e   : > { %v2545_v27 = vadd.f32 %v4468_v4, %v2522_v20  ;;  %v2521_v58 = vadd.f32 %v4658_v62, %v2351_v51  ;;  %v2354_v57 = vadd.f32 %v3381_v3, %v2184_v13  ;;  %v3469_v20 = vld [vmem:[%s3610_s19] sm:$0xff]  ;;  %v4668_v13 = vld [vmem:[#allocation27_spill] sm:$0xff]  ;;  %v4670_v3 = vld [vmem:[#allocation28_spill] sm:$0xff] }
 0x23f   : > { %v2282_v7 = vpop.f32.mrf.mxu1  ;;  %v2021_v11 = vadd.f32 %v4670_v3, %v1851_v16 }
 0x240   : > { %vm2561_vm2 = vcmp.gt.f32.partialorder %v2545_v27, 0.0  ;;  %v2577_v40 = vmul.f32 0.01, %v2545_v27  ;;  %v2544_v9 = vadd.f32 %v4468_v4, %v2521_v58  ;;  %v2524_v46 = vadd.f32 %v4663_v33, %v2354_v57  ;;  %v3470_v57 = vld [vmem:[%s3610_s19 + $0x18] sm:$0xff]  ;;  %v2492_v33 = vpop.f32.mrf.mxu0 }
 0x241   : > { %v2353_v14 = vadd.f32 %v2282_v7, %v2183_v47  ;;  %v3384_v50 = vpop.f32.mrf.mxu1 }
 0x242   : > { %v2593_v26 = vsel %vm2561_vm2, %v2545_v27, %v2577_v40  ;;  %vm2560_vm4 = vcmp.gt.f32.partialorder %v2544_v9, 0.0  ;;  %v2576_v59 = vmul.f32 0.01, %v2544_v9  ;;  %v2547_v52 = vadd.f32 %v4468_v4, %v2524_v46  ;;  %v3471_v46 = vld [vmem:[%s3610_s19 + $0x10] sm:$0xff] }
 0x243   : > { %v2609_v35 = vadd.f32 %v3468_v38, %v2593_v26  ;;  %v2523_v56 = vadd.f32 %v4667_v18, %v2353_v14  ;;  %v2356_v8 = vadd.f32 %v3384_v50, %v2186_v61  ;;  %v2292_v44 = vpop.f32.mrf.mxu1  ;;  %v3472_v26 = vld [vmem:[%s3610_s19 + $0x28] sm:$0xff] }
 0x244   : > { %v2592_v29 = vsel %vm2560_vm4, %v2544_v9, %v2576_v59  ;;  %vm2563_vm7 = vcmp.gt.f32.partialorder %v2547_v52, 0.0  ;;  %v2579_v45 = vmul.f32 0.01, %v2547_v52  ;;  %v2355_v55 = vadd.f32 %v2292_v44, %v2185_v31  ;;  %v4671_v31 = vld [vmem:[#allocation16_spill] sm:$0xff] }
 0x245   : > { %2625 = vst.msk [vmem:[%s4502_s25 + $0x8] sm:$0xff] %vm419_vm1, %v2609_v35  ;;  %v2608_v51 = vadd.f32 %v3469_v20, %v2592_v29  ;;  %v2546_v2 = vadd.f32 %v4468_v4, %v2523_v56  ;;  %v2526_v28 = vadd.f32 %v4668_v13, %v2356_v8  ;;  %v3387_v41 = vpop.f32.mrf.mxu1  ;;  %v2192_v15 = vadd.f32 %v4671_v31, %v2022_v5  ;;  %v3473_v5 = vld [vmem:[%s3610_s19 + $0x20] sm:$0xff]  ;;  %v3422_v56 = vpop.f32.mrf.mxu0 }
 0x246   : > { %v2595_v27 = vsel %vm2563_vm7, %v2547_v52, %v2579_v45  ;;  %v2525_v62 = vadd.f32 %v4428_v43, %v2355_v55  ;;  %v2358_v58 = vadd.f32 %v3387_v41, %v2188_v49  ;;  %v2024_v43 = vadd.f32 %v4423_v30, %v4471_v19  ;;  %v3474_v55 = vld [vmem:[%s3610_s19 + $0x38] sm:$0xff] }
 0x247   : > { %2624 = vst.msk [vmem:[%s4502_s25] sm:$0xff] %vm419_vm1, %v2608_v51  ;;  %v2611_v12 = vadd.f32 %v3470_v57, %v2595_v27  ;;  %vm2562_vm8 = vcmp.gt.f32.partialorder %v2546_v2, 0.0  ;;  %v2578_v47 = vmul.f32 0.01, %v2546_v2  ;;  %v2549_v7 = vadd.f32 %v4468_v4, %v2526_v28  ;;  %v2302_v63 = vpop.f32.mrf.mxu1  ;;  %v2502_v3 = vpop.f32.mrf.mxu0 }
 0x248   : > { %v2548_v61 = vadd.f32 %v4468_v4, %v2525_v62  ;;  %v2528_v48 = vadd.f32 %v4445_v0, %v2358_v58  ;;  %v2357_v16 = vadd.f32 %v2302_v63, %v2187_v34  ;;  %v4672_v34 = vld [vmem:[#allocation17_spill] sm:$0xff]  ;;  %v2023_v8 = vadd.f32 %v4434_v53, %v4476_v54  ;;  %v3476_v63 = vld [vmem:[%s3610_s19 + $0x48] sm:$0xff] }
 0x249   : > { %2627 = vst.msk [vmem:[%s4502_s25 + $0x18] sm:$0xff] %vm419_vm1, %v2611_v12  ;;  %v2594_v49 = vsel %vm2562_vm8, %v2546_v2, %v2578_v47  ;;  %vm2565_vm12 = vcmp.gt.f32.partialorder %v2549_v7, 0.0  ;;  %v2581_v40 = vmul.f32 0.01, %v2549_v7  ;;  %v3390_v9 = vpop.f32.mrf.mxu1  ;;  %v2191_v17 = vadd.f32 %v4672_v34, %v2021_v11  ;;  %v3475_v11 = vld [vmem:[%s3610_s19 + $0x30] sm:$0xff]  ;;  %v4674_v12 = vld [vmem:[#allocation19_spill] sm:$0xff] }
 0x24a   : > { %v2610_v37 = vadd.f32 %v3471_v46, %v2594_v49  ;;  %vm2564_vm13 = vcmp.gt.f32.partialorder %v2548_v61, 0.0  ;;  %v2580_v0 = vmul.f32 0.01, %v2548_v61  ;;  %v2551_v14 = vadd.f32 %v4468_v4, %v2528_v48  ;;  %v4675_v47 = vld [vmem:[#allocation20_spill] sm:$0xff]  ;;  %v4676_v46 = vld [vmem:[#allocation21_spill] sm:$0xff] }
 0x24b   : > { %v2597_v50 = vsel %vm2565_vm12, %v2549_v7, %v2581_v40  ;;  %v2527_v36 = vadd.f32 %v4461_v23, %v2357_v16  ;;  %v2360_v30 = vadd.f32 %v3390_v9, %v2190_v24  ;;  %v2312_v19 = vpop.f32.mrf.mxu1  ;;  %v2026_v44 = vadd.f32 %v4440_v25, %v4479_v1  ;;  %v4673_v25 = vld [vmem:[#allocation18_spill] sm:$0xff]  ;;  %v3425_v40 = vpop.f32.mrf.mxu0 }
 0x24c   : > { %2626 = vst.msk [vmem:[%s4502_s25 + $0x10] sm:$0xff] %vm419_vm1, %v2610_v37  ;;  %v2613_v59 = vadd.f32 %v3472_v26, %v2597_v50  ;;  %v2596_v52 = vsel %vm2564_vm13, %v2548_v61, %v2580_v0  ;;  %vm2567_vm9 = vcmp.gt.f32.partialorder %v2551_v14, 0.0  ;;  %v2583_v39 = vmul.f32 0.01, %v2551_v14  ;;  %v3477_v0 = vld [vmem:[%s3610_s19 + $0x40] sm:$0xff] }
 0x24d   : > { %v2612_v38 = vadd.f32 %v3473_v5, %v2596_v52  ;;  %v2550_v35 = vadd.f32 %v4468_v4, %v2527_v36  ;;  %v2530_v23 = vadd.f32 %v4481_v6, %v2360_v30  ;;  %v2359_v24 = vadd.f32 %v2312_v19, %v2189_v22  ;;  %v3393_v18 = vpop.f32.mrf.mxu1  ;;  %v3478_v19 = vld [vmem:[%s3610_s19 + $0x58] sm:$0xff]  ;;  %v2512_v5 = vpop.f32.mrf.mxu0 }
 0x24e   : > { %2629 = vst.msk [vmem:[%s4502_s25 + $0x28] sm:$0xff] %vm419_vm1, %v2613_v59  ;;  %v2599_v29 = vsel %vm2567_vm9, %v2551_v14, %v2583_v39  ;;  %v2362_v45 = vadd.f32 %v3393_v18, %v2192_v15  ;;  %v2194_v1 = vadd.f32 %v4673_v25, %v2024_v43  ;;  %v2025_v28 = vadd.f32 %v4451_v60, %v4484_v32 }
 0x24f   : > { %2628 = vst.msk [vmem:[%s4502_s25 + $0x20] sm:$0xff] %vm419_vm1, %v2612_v38  ;;  %v2615_v20 = vadd.f32 %v3474_v55, %v2599_v29  ;;  %vm2566_vm10 = vcmp.gt.f32.partialorder %v2550_v35, 0.0  ;;  %v2582_v6 = vmul.f32 0.01, %v2550_v35  ;;  %v2553_v51 = vadd.f32 %v4468_v4, %v2530_v23  ;;  %v2322_v2 = vpop.f32.mrf.mxu1  ;;  %v3479_v38 = vld [vmem:[%s3610_s19 + $0x50] sm:$0xff]  ;;  %v3480_v29 = vld [vmem:[%s3610_s19 + $0x68] sm:$0xff] }
 0x250   : > { %v2529_v53 = vadd.f32 %v4504_v10, %v2359_v24  ;;  %v2532_v54 = vadd.f32 %v3419_v21, %v2362_v45  ;;  %v2361_v13 = vadd.f32 %v2322_v2, %v2191_v17  ;;  %v2193_v60 = vadd.f32 %v4674_v12, %v2023_v8 }
 0x251   : > { %2631 = vst.msk [vmem:[%s4502_s25 + $0x38] sm:$0xff] %vm419_vm1, %v2615_v20  ;;  %v2598_v41 = vsel %vm2566_vm10, %v2550_v35, %v2582_v6  ;;  %vm2569_vm11 = vcmp.gt.f32.partialorder %v2553_v51, 0.0  ;;  %v2585_v42 = vmul.f32 0.01, %v2553_v51  ;;  %v3396_v22 = vpop.f32.mrf.mxu1  ;;  %v2196_v7 = vadd.f32 %v4675_v47, %v2026_v44 }
 0x252   : > { %v2614_v27 = vadd.f32 %v3475_v11, %v2598_v41  ;;  %v2552_v10 = vadd.f32 %v4468_v4, %v2529_v53  ;;  %v2555_v21 = vadd.f32 %v4468_v4, %v2532_v54  ;;  %v2531_v62 = vadd.f32 %v2492_v33, %v2361_v13  ;;  %v3482_v13 = vld [vmem:[%s3610_s19 + $0x78] sm:$0xff] }
 0x253   : > { %v2601_v58 = vsel %vm2569_vm11, %v2553_v51, %v2585_v42  ;;  %v2364_v57 = vadd.f32 %v3396_v22, %v2194_v1  ;;  %v2332_v32 = vpop.f32.mrf.mxu1  ;;  %v2195_v37 = vadd.f32 %v4676_v46, %v2025_v28  ;;  %v3481_v51 = vld [vmem:[%s3610_s19 + $0x60] sm:$0xff]  ;;  %v3483_v28 = vld [vmem:[%s3610_s19 + $0x70] sm:$0xff] }
 0x254   : > { %2630 = vst.msk [vmem:[%s4502_s25 + $0x30] sm:$0xff] %vm419_vm1, %v2614_v27  ;;  %v2617_v61 = vadd.f32 %v3476_v63, %v2601_v58  ;;  %vm2568_vm14 = vcmp.gt.f32.partialorder %v2552_v10, 0.0  ;;  %v2584_v48 = vmul.f32 0.01, %v2552_v10  ;;  %vm2571_vm15 = vcmp.gt.f32.partialorder %v2555_v21, 0.0 }
 0x255   : > { %v2587_v16 = vmul.f32 0.01, %v2555_v21  ;;  %v2554_v31 = vadd.f32 %v4468_v4, %v2531_v62  ;;  %v2534_v15 = vadd.f32 %v3422_v56, %v2364_v57  ;;  %v2363_v43 = vadd.f32 %v2332_v32, %v2193_v60  ;;  %v3399_v49 = vpop.f32.mrf.mxu1 }
 0x256   : > { %2633 = vst.msk [vmem:[%s4502_s25 + $0x48] sm:$0xff] %vm419_vm1, %v2617_v61  ;;  %v2600_v9 = vsel %vm2568_vm14, %v2552_v10, %v2584_v48  ;;  %v2366_v33 = vadd.f32 %v3399_v49, %v2196_v7 }
 0x257   : > { %v2616_v14 = vadd.f32 %v3477_v0, %v2600_v9  ;;  %v2603_v50 = vsel %vm2571_vm15, %v2555_v21, %v2587_v16  ;;  %vm2570_vm0 = vcmp.gt.f32.partialorder %v2554_v31, 0.0  ;;  %v2586_v36 = vmul.f32 0.01, %v2554_v31  ;;  %v2342_v30 = vpop.f32.mrf.mxu1 }
 0x258   : > { %v2619_v34 = vadd.f32 %v3478_v19, %v2603_v50  ;;  %v2557_v17 = vadd.f32 %v4468_v4, %v2534_v15  ;;  %v2533_v26 = vadd.f32 %v2502_v3, %v2363_v43  ;;  %v2536_v59 = vadd.f32 %v3425_v40, %v2366_v33 }
 0x259   : > { %2632 = vst.msk [vmem:[%s4502_s25 + $0x40] sm:$0xff] %vm419_vm1, %v2616_v14  ;;  %v2602_v52 = vsel %vm2570_vm0, %v2554_v31, %v2586_v36  ;;  %v2365_v39 = vadd.f32 %v2342_v30, %v2195_v37 }
 0x25a   : > { %2635 = vst.msk [vmem:[%s4502_s25 + $0x58] sm:$0xff] %vm419_vm1, %v2619_v34  ;;  %v2618_v35 = vadd.f32 %v3479_v38, %v2602_v52  ;;  %vm2573_vm3 = vcmp.gt.f32.partialorder %v2557_v17, 0.0  ;;  %v2589_v23 = vmul.f32 0.01, %v2557_v17  ;;  %v2556_v24 = vadd.f32 %v4468_v4, %v2533_v26 }
 0x25b   : > { %v2559_v18 = vadd.f32 %v4468_v4, %v2536_v59  ;;  %v2535_v56 = vadd.f32 %v2512_v5, %v2365_v39 }
 0x25c   : > { %2634 = vst.msk [vmem:[%s4502_s25 + $0x50] sm:$0xff] %vm419_vm1, %v2618_v35  ;;  %v2605_v8 = vsel %vm2573_vm3, %v2557_v17, %v2589_v23  ;;  %vm2572_vm5 = vcmp.gt.f32.partialorder %v2556_v24, 0.0  ;;  %v2588_v44 = vmul.f32 0.01, %v2556_v24 }
 0x25d   : > { %v2621_v45 = vadd.f32 %v3480_v29, %v2605_v8  ;;  %vm2575_vm6 = vcmp.gt.f32.partialorder %v2559_v18, 0.0  ;;  %v2591_v55 = vmul.f32 0.01, %v2559_v18  ;;  %v2558_v20 = vadd.f32 %v4468_v4, %v2535_v56 }
 0x25e   : > { %v2604_v6 = vsel %vm2572_vm5, %v2556_v24, %v2588_v44 }
 0x25f   : > { %2637 = vst.msk [vmem:[%s4502_s25 + $0x68] sm:$0xff] %vm419_vm1, %v2621_v45  ;;  %v2620_v2 = vadd.f32 %v3481_v51, %v2604_v6  ;;  %v2607_v53 = vsel %vm2575_vm6, %v2559_v18, %v2591_v55  ;;  %vm2574_vm2 = vcmp.gt.f32.partialorder %v2558_v20, 0.0  ;;  %v2590_v54 = vmul.f32 0.01, %v2558_v20 }
 0x260   : > { %v2623_v25 = vadd.f32 %v3482_v13, %v2607_v53 }
 0x261   : > { %2636 = vst.msk [vmem:[%s4502_s25 + $0x60] sm:$0xff] %vm419_vm1, %v2620_v2  ;;  %v2606_v1 = vsel %vm2574_vm2, %v2558_v20, %v2590_v54 }
 0x262   : > { %2639 = vst.msk [vmem:[%s4502_s25 + $0x78] sm:$0xff] %vm419_vm1, %v2623_v25  ;;  %v2622_v41 = vadd.f32 %v3483_v28, %v2606_v1 }
 0x264   : > { %2638 = vst.msk [vmem:[%s4502_s25 + $0x70] sm:$0xff] %vm419_vm1, %v2622_v41 }
 0x265 PF: > { %s17_s28 = sadd.s32 1, %s3522_s28   ;;  %s4677_s24 = smov %s3514_s26 }
 0x266   : > { %p14_p10 = scmp.ge.s32.totalorder %s17_s28, 6   ;;  %s4678_s25 = smov %s3518_s27 }
 0x267   : > { %s4679_s26 = smov %s4682_s29  ;;  %s4680_s27 = smov %s4686_s30 }
 0x268   :  { %16 = sbr.rel (!%p14_p10) target bundleno = 3 (0x3), region = 92 }

</bundles_post_ra>
